<compile_context>
chip_gen: v7x
topology: tpu7x:2x2x1
jax: 0.10.0
libtpu: 0.0.40
codegen_flags: <defaults>
</compile_context>

<pallas_src>
import functools

import jax
import jax.numpy as jnp
from jax.experimental import pallas as pl
from jax.experimental.pallas import tpu as pltpu


def mha_kernel(*refs, n_heads, d_k, d_v, ln_eps, return_attn, attn_dtype):
    f32 = jnp.float32
    bf16 = jnp.bfloat16

    (bias_ref, q_ref, k_ref, v_ref,
     wq_ref, bq_ref, wk_ref, bk_ref, wv_ref, bv_ref,
     wfc_ref, bfc_ref, gamma_ref, beta_ref) = refs[:14]
    if return_attn:
        out_ref, attn_ref, k_scr, v_scr, ctx_scr = refs[14:]
    else:
        out_ref, k_scr, v_scr, ctx_scr = refs[14:]
        attn_ref = None

    qi = pl.program_id(1)

    q_in = q_ref[0]                      # [TQ, d_model] f32 (residual input)
    bias = bias_ref[0]                   # [1, S] additive key mask (0 / -1e30)

    # ---- K/V projections, all heads in one full-width matmul each, hoisted
    # ---- to the first query block of every batch element ------------------
    @pl.when(qi == 0)
    def _():
        k_all = jnp.dot(k_ref[0], wk_ref[...],
                        preferred_element_type=f32) + bk_ref[...]   # [S, H*d_k]
        v_all = jnp.dot(v_ref[0], wv_ref[...],
                        preferred_element_type=f32) + bv_ref[...]   # [S, H*d_v]
        k_scr[...] = k_all.astype(bf16)
        v_scr[...] = v_all.astype(bf16)

    # ---- Q projection, all heads at once (scale pre-folded into W_Q/b_Q) --
    q_all = jnp.dot(q_in.astype(bf16), wq_ref[...],
                    preferred_element_type=f32) + bq_ref[...]       # [TQ, H*d_k]

    # ---- per-head attention: 2-D matmuls on static lane slices ------------
    for h in range(n_heads):
        qh = q_all[:, h * d_k:(h + 1) * d_k].astype(bf16)           # [TQ, d_k]
        kh = k_scr[:, h * d_k:(h + 1) * d_k]                        # [S,  d_k]
        vh = v_scr[:, h * d_v:(h + 1) * d_v]                        # [S,  d_v]

        # scores = qh @ kh^T (contract last axes; no materialized transpose)
        scores = jax.lax.dot_general(
            qh, kh, dimension_numbers=(((1,), (1,)), ((), ())),
            preferred_element_type=f32)                             # [TQ, S]
        scores = scores + bias

        # softmax over keys (f32 elementwise; EUP approx reciprocal)
        m = jnp.max(scores, axis=-1, keepdims=True)
        e = jnp.exp(scores - m)
        denom = jnp.sum(e, axis=-1, keepdims=True)
        attn = e * pl.reciprocal(denom, approx=True)                # [TQ, S]

        if return_attn:
            attn_ref[0, h] = attn.astype(attn_dtype)

        # this head's context, staged into the fused-context scratch slab
        ctx_scr[:, h * d_v:(h + 1) * d_v] = jnp.dot(
            attn.astype(bf16), vh, preferred_element_type=f32).astype(bf16)

    # ---- single full-width output projection + residual + LayerNorm -------
    proj = jnp.dot(ctx_scr[...], wfc_ref[...],
                   preferred_element_type=f32)                      # [TQ, d_model]
    res = proj + bfc_ref[...] + q_in
    mean = jnp.mean(res, axis=-1, keepdims=True)
    var = jnp.mean((res - mean) ** 2, axis=-1, keepdims=True)
    normed = (res - mean) * jax.lax.rsqrt(var + ln_eps)
    out_ref[0] = normed * gamma_ref[...] + beta_ref[...]


def multi_head_attention(Q, K, V, attn_mask, params, *, n_heads, d_k, d_v,
                         tq=None, return_attn=True, attn_dtype=jnp.float32,
                         ln_eps=1e-5):
    B, S, d_model = Q.shape
    wq, bq, wk, bk, wv, bv, wfc, bfc, gamma, beta = params

    f32 = jnp.float32
    bf16 = jnp.bfloat16
    scale = 1.0 / (float(d_k) ** 0.5)

    # Query tiling: full sequence if small, else 128-row query blocks.
    # (On v5e/v6e with 128 MiB VMEM, tq=256 is a reasonable override for
    #  moderate S; on v7x keep B*nq >= 2 so both TensorCores are used.)
    TQ = (S if S <= 128 else 128) if tq is None else tq
    assert S % TQ == 0, "seq length must be a multiple of the query tile"
    nq = S // TQ

    # ---- wrapper-side layout plumbing (one-time, tiny) ----------------------
    # Fold 1/sqrt(d_k) into the Q projection; cast MXU weight operands and the
    # full-seq K/V activations to bf16; biases / LN params / Q stay f32.
    wq_c = (wq * scale).astype(bf16)                 # [d_model, H*d_k]
    bq_c = (bq * scale).astype(f32)                  # [1, H*d_k]
    wk_c = wk.astype(bf16)
    bk_c = bk.astype(f32)
    wv_c = wv.astype(bf16)
    bv_c = bv.astype(f32)
    wfc_c = wfc.astype(bf16)                         # [H*d_v, d_model]
    bfc_c = bfc.astype(f32)
    gamma_c = gamma.astype(f32)
    beta_c = beta.astype(f32)
    K_bf = K.astype(bf16)
    V_bf = V.astype(bf16)

    # Additive key-padding mask bias, once per batch element.
    mask_bias = jnp.where(attn_mask == 0, -1e30, 0.0).astype(f32).reshape(B, 1, S)

    kernel = functools.partial(
        mha_kernel, n_heads=n_heads, d_k=d_k, d_v=d_v, ln_eps=ln_eps,
        return_attn=return_attn, attn_dtype=attn_dtype)

    in_specs = [
        pl.BlockSpec((1, 1, S), lambda b, qi: (b, 0, 0)),            # mask bias
        pl.BlockSpec((1, TQ, d_model), lambda b, qi: (b, qi, 0)),    # Q block (f32)
        pl.BlockSpec((1, S, d_model), lambda b, qi: (b, 0, 0)),      # K (bf16, full seq)
        pl.BlockSpec((1, S, d_model), lambda b, qi: (b, 0, 0)),      # V (bf16, full seq)
        pl.BlockSpec((d_model, n_heads * d_k), lambda b, qi: (0, 0)),  # W_Q (scaled)
        pl.BlockSpec((1, n_heads * d_k), lambda b, qi: (0, 0)),        # b_Q (scaled)
        pl.BlockSpec((d_model, n_heads * d_k), lambda b, qi: (0, 0)),  # W_K
        pl.BlockSpec((1, n_heads * d_k), lambda b, qi: (0, 0)),        # b_K
        pl.BlockSpec((d_model, n_heads * d_v), lambda b, qi: (0, 0)),  # W_V
        pl.BlockSpec((1, n_heads * d_v), lambda b, qi: (0, 0)),        # b_V
        pl.BlockSpec((n_heads * d_v, d_model), lambda b, qi: (0, 0)),  # W_fc
        pl.BlockSpec((1, d_model), lambda b, qi: (0, 0)),              # b_fc
        pl.BlockSpec((1, d_model), lambda b, qi: (0, 0)),              # gamma
        pl.BlockSpec((1, d_model), lambda b, qi: (0, 0)),              # beta
    ]

    out_spec_y = pl.BlockSpec((1, TQ, d_model), lambda b, qi: (b, qi, 0))
    if return_attn:
        out_shapes = (
            jax.ShapeDtypeStruct((B, S, d_model), f32),
            jax.ShapeDtypeStruct((B, n_heads, S, S), attn_dtype),
        )
        out_specs = [
            out_spec_y,
            pl.BlockSpec((1, n_heads, TQ, S), lambda b, qi: (b, 0, qi, 0)),
        ]
    else:
        out_shapes = jax.ShapeDtypeStruct((B, S, d_model), f32)
        out_specs = out_spec_y

    scratch_shapes = [
        pltpu.VMEM((S, n_heads * d_k), bf16),    # projected K (all heads), per batch
        pltpu.VMEM((S, n_heads * d_v), bf16),    # projected V (all heads), per batch
        pltpu.VMEM((TQ, n_heads * d_v), bf16),   # fused context slab, per query block
    ]

    # ---- VMEM budget, re-derived for bf16 K/V + attn block (v7x 64 MiB) -----
    attn_isz = jnp.dtype(attn_dtype).itemsize
    blk_bytes = (
        4 * S                                              # mask bias
        + 4 * TQ * d_model                                 # Q block
        + 2 * 2 * S * d_model                              # K + V blocks (bf16)
        + 2 * d_model * n_heads * (2 * d_k + d_v)          # W_Q, W_K, W_V (bf16)
        + 2 * n_heads * d_v * d_model                      # W_fc (bf16)
        + 4 * (n_heads * (2 * d_k + d_v) + 3 * d_model)    # biases + LN params
        + 4 * TQ * d_model                                 # output block
        + (attn_isz * n_heads * TQ * S if return_attn else 0)
        + 2 * S * n_heads * (d_k + d_v) + 2 * TQ * n_heads * d_v   # VMEM scratch
    )
    vmem_limit = int(min(40 * 1024 * 1024, max(3 * blk_bytes, 32 * 1024 * 1024)))

    # ---- cost estimate (K/V projections counted once per batch: hoisted) ----
    flops = int(
        2 * B * S * d_model * n_heads * (2 * d_k + d_v)    # Q/K/V projections
        + 2 * B * n_heads * S * S * (d_k + d_v)            # scores + context
        + 2 * B * S * n_heads * d_v * d_model              # output projection
    )
    transcendentals = int(B * n_heads * S * S + B * n_heads * S + B * S)
    param_bytes = int(sum(int(p.size) * p.dtype.itemsize for p in
                          (wq_c, bq_c, wk_c, bk_c, wv_c, bv_c, wfc_c,
                           bfc_c, gamma_c, beta_c)))
    bytes_accessed = int(
        4 * B * S * d_model                      # Q (f32)
        + 2 * 2 * B * S * d_model                # K + V (bf16)
        + 4 * B * S                              # mask
        + 4 * B * S * d_model                    # output
        + (attn_isz * B * n_heads * S * S if return_attn else 0)
        + param_bytes)

    return pl.pallas_call(
        kernel,
        out_shape=out_shapes,
        grid_spec=pltpu.PrefetchScalarGridSpec(
            num_scalar_prefetch=0,
            grid=(B, nq),                         # heads folded into the body
            in_specs=in_specs,
            out_specs=out_specs,
            scratch_shapes=scratch_shapes,
        ),
        compiler_params=pltpu.CompilerParams(
            # batch parallel (megacore); query axis sequential so the qi==0
            # K/V-projection scratch is valid for qi>0 of the same batch.
            dimension_semantics=("parallel", "arbitrary"),
            vmem_limit_bytes=vmem_limit,
        ),
        cost_estimate=pl.CostEstimate(
            flops=flops, transcendentals=transcendentals,
            bytes_accessed=bytes_accessed),
    )(mask_bias, Q, K_bf, V_bf,
      wq_c, bq_c, wk_c, bk_c, wv_c, bv_c, wfc_c, bfc_c, gamma_c, beta_c)


def init_params(key, d_model, d_k, d_v, n_heads):
    ks = jax.random.split(key, 8)
    s = 0.05
    wq = s * jax.random.normal(ks[0], (d_model, d_k * n_heads), jnp.float32)
    bq = s * jax.random.normal(ks[1], (1, d_k * n_heads), jnp.float32)
    wk = s * jax.random.normal(ks[2], (d_model, d_k * n_heads), jnp.float32)
    bk = s * jax.random.normal(ks[3], (1, d_k * n_heads), jnp.float32)
    wv = s * jax.random.normal(ks[4], (d_model, d_v * n_heads), jnp.float32)
    bv = s * jax.random.normal(ks[5], (1, d_v * n_heads), jnp.float32)
    wfc = s * jax.random.normal(ks[6], (n_heads * d_v, d_model), jnp.float32)
    bfc = s * jax.random.normal(ks[7], (1, d_model), jnp.float32)
    gamma = jnp.ones((1, d_model), jnp.float32)   # nn.LayerNorm default weight
    beta = jnp.zeros((1, d_model), jnp.float32)   # nn.LayerNorm default bias
    return (wq, bq, wk, bk, wv, bv, wfc, bfc, gamma, beta)


def mha_reference(Q, K, V, attn_mask, params, *, n_heads, d_k, d_v, ln_eps=1e-5):
    """Pure-JAX f32 reference of the PyTorch forward (for a sanity check)."""
    wq, bq, wk, bk, wv, bv, wfc, bfc, gamma, beta = params
    B, S, d_model = Q.shape
    q_s = (Q @ wq + bq).reshape(B, S, n_heads, d_k).transpose(0, 2, 1, 3)
    k_s = (K @ wk + bk).reshape(B, S, n_heads, d_k).transpose(0, 2, 1, 3)
    v_s = (V @ wv + bv).reshape(B, S, n_heads, d_v).transpose(0, 2, 1, 3)
    scores = jnp.einsum('bhqd,bhkd->bhqk', q_s, k_s) / (float(d_k) ** 0.5)
    scores = jnp.where(attn_mask[:, None, None, :] == 0, -1e30, scores)
    attn = jax.nn.softmax(scores, axis=-1)
    ctx = jnp.einsum('bhqk,bhkd->bhqd', attn, v_s)
    ctx = ctx.transpose(0, 2, 1, 3).reshape(B, S, n_heads * d_v)
    out = ctx @ wfc + bfc
    res = out + Q
    mean = res.mean(-1, keepdims=True)
    var = ((res - mean) ** 2).mean(-1, keepdims=True)
    normed = (res - mean) / jnp.sqrt(var + ln_eps)
    return normed * gamma + beta, attn


if __name__ == "__main__":
    # Small shapes consistent with the module's forward.
    B, S = 2, 8
    d_model, d_k, d_v, n_heads = 32, 8, 8, 4

    key = jax.random.PRNGKey(0)
    kq, kk, kv, kp = jax.random.split(key, 4)
    Q = jax.random.normal(kq, (B, S, d_model), jnp.float32)
    K = jax.random.normal(kk, (B, S, d_model), jnp.float32)
    V = jax.random.normal(kv, (B, S, d_model), jnp.float32)

    # Padding-style key mask [B, S]: 1 = attend, 0 = masked (last 2 keys of
    # batch 0 are padding). Every query row keeps at least one valid key.
    attn_mask = jnp.ones((B, S), jnp.int32).at[0, S - 2:].set(0)

    params = init_params(kp, d_model, d_k, d_v, n_heads)

    out, attn = multi_head_attention(Q, K, V, attn_mask, params,
                                     n_heads=n_heads, d_k=d_k, d_v=d_v)
    jax.block_until_ready((out, attn))

    assert out.shape == (B, S, d_model)
    assert attn.shape == (B, n_heads, S, S)

    # Sanity check vs pure-JAX f32 reference (bf16 MXU operands + approx
    # reciprocal => loose tolerance).
    ref_out, ref_attn = mha_reference(Q, K, V, attn_mask, params,
                                      n_heads=n_heads, d_k=d_k, d_v=d_v)
    out_err = float(jnp.max(jnp.abs(out - ref_out)))
    attn_err = float(jnp.max(jnp.abs(attn.astype(jnp.float32) - ref_attn)))
    assert out_err < 5e-2, f"output mismatch: {out_err}"
    assert attn_err < 5e-2, f"attn mismatch: {attn_err}"

    print("KERNEL_OK")
</pallas_src>

<mosaic_0001>
module attributes {stable_mosaic.version = 11 : i64} {
  func.func @mha_kernel(%arg0: i32, %arg1: i32, %arg2: memref<1x1x8xf32, #tpu.memory_space<vmem>>, %arg3: memref<1x8x32xf32, #tpu.memory_space<vmem>>, %arg4: memref<1x8x32xbf16, #tpu.memory_space<vmem>>, %arg5: memref<1x8x32xbf16, #tpu.memory_space<vmem>>, %arg6: memref<32x32xbf16, #tpu.memory_space<vmem>>, %arg7: memref<1x32xf32, #tpu.memory_space<vmem>>, %arg8: memref<32x32xbf16, #tpu.memory_space<vmem>>, %arg9: memref<1x32xf32, #tpu.memory_space<vmem>>, %arg10: memref<32x32xbf16, #tpu.memory_space<vmem>>, %arg11: memref<1x32xf32, #tpu.memory_space<vmem>>, %arg12: memref<32x32xbf16, #tpu.memory_space<vmem>>, %arg13: memref<1x32xf32, #tpu.memory_space<vmem>>, %arg14: memref<1x32xf32, #tpu.memory_space<vmem>>, %arg15: memref<1x32xf32, #tpu.memory_space<vmem>>, %arg16: memref<1x8x32xf32, #tpu.memory_space<vmem>>, %arg17: memref<1x4x8x8xf32, #tpu.memory_space<vmem>>, %arg18: memref<8x32xbf16, #tpu.memory_space<vmem>>, %arg19: memref<8x32xbf16, #tpu.memory_space<vmem>>, %arg20: memref<8x32xbf16, #tpu.memory_space<vmem>>) attributes {dimension_semantics = [#tpu.dimension_semantics<parallel>, #tpu.dimension_semantics<arbitrary>], iteration_bounds = array<i64: 2, 1>, scalar_prefetch = 0 : i64, scratch_operands = 3 : i64, tpu.core_type = #tpu.core_type<tc>, window_params = [{transform_indices = @transform_0, window_bounds = array<i64: 1, 1, 8>}, {transform_indices = @transform_1, window_bounds = array<i64: 1, 8, 32>}, {transform_indices = @transform_2, window_bounds = array<i64: 1, 8, 32>}, {transform_indices = @transform_3, window_bounds = array<i64: 1, 8, 32>}, {pipeline_mode = #tpu.pipeline_mode<synchronous>, transform_indices = @transform_4, window_bounds = array<i64: 32, 32>}, {pipeline_mode = #tpu.pipeline_mode<synchronous>, transform_indices = @transform_5, window_bounds = array<i64: 1, 32>}, {pipeline_mode = #tpu.pipeline_mode<synchronous>, transform_indices = @transform_6, window_bounds = array<i64: 32, 32>}, {pipeline_mode = #tpu.pipeline_mode<synchronous>, transform_indices = @transform_7, window_bounds = array<i64: 1, 32>}, {pipeline_mode = #tpu.pipeline_mode<synchronous>, transform_indices = @transform_8, window_bounds = array<i64: 32, 32>}, {pipeline_mode = #tpu.pipeline_mode<synchronous>, transform_indices = @transform_9, window_bounds = array<i64: 1, 32>}, {pipeline_mode = #tpu.pipeline_mode<synchronous>, transform_indices = @transform_10, window_bounds = array<i64: 32, 32>}, {pipeline_mode = #tpu.pipeline_mode<synchronous>, transform_indices = @transform_11, window_bounds = array<i64: 1, 32>}, {pipeline_mode = #tpu.pipeline_mode<synchronous>, transform_indices = @transform_12, window_bounds = array<i64: 1, 32>}, {pipeline_mode = #tpu.pipeline_mode<synchronous>, transform_indices = @transform_13, window_bounds = array<i64: 1, 32>}, {transform_indices = @transform_14, window_bounds = array<i64: 1, 8, 32>}, {transform_indices = @transform_15, window_bounds = array<i64: 1, 4, 8, 8>}]} {
    %c0 = arith.constant 0 : index
    %c0_0 = arith.constant 0 : index
    %c0_1 = arith.constant 0 : index
    %0 = vector.load %arg3[%c0, %c0_0, %c0_1] : memref<1x8x32xf32, #tpu.memory_space<vmem>>, vector<1x8x32xf32>
    %1 = vector.shape_cast %0 : vector<1x8x32xf32> to vector<8x32xf32>
    %c0_2 = arith.constant 0 : index
    %c0_3 = arith.constant 0 : index
    %c0_4 = arith.constant 0 : index
    %2 = vector.load %arg2[%c0_2, %c0_3, %c0_4] : memref<1x1x8xf32, #tpu.memory_space<vmem>>, vector<1x1x8xf32>
    %3 = vector.shape_cast %2 : vector<1x1x8xf32> to vector<1x8xf32>
    %c0_i32 = arith.constant 0 : i32
    %4 = arith.cmpi eq, %arg1, %c0_i32 : i32
    %5 = arith.extui %4 : i1 to i32
    %c0_i32_5 = arith.constant 0 : i32
    %6 = arith.cmpi ne, %5, %c0_i32_5 : i32
    scf.if %6 {
      %c0_79 = arith.constant 0 : index
      %c0_80 = arith.constant 0 : index
      %c0_81 = arith.constant 0 : index
      %143 = vector.load %arg4[%c0_79, %c0_80, %c0_81] : memref<1x8x32xbf16, #tpu.memory_space<vmem>>, vector<1x8x32xbf16>
      %144 = vector.shape_cast %143 : vector<1x8x32xbf16> to vector<8x32xbf16>
      %c0_82 = arith.constant 0 : index
      %c0_83 = arith.constant 0 : index
      %145 = vector.load %arg8[%c0_82, %c0_83] : memref<32x32xbf16, #tpu.memory_space<vmem>>, vector<32x32xbf16>
      %cst_84 = arith.constant dense<0.000000e+00> : vector<8x32xf32>
      %146 = tpu.matmul %144, %145, %cst_84 {dimension_numbers = #tpu.dot_dimension_numbers<[1], [0], [0], [1], [0, 0, 1, 1], [], []>} : vector<8x32xbf16>, vector<32x32xbf16>, vector<8x32xf32> -> vector<8x32xf32>
      %c0_85 = arith.constant 0 : index
      %c0_86 = arith.constant 0 : index
      %147 = vector.load %arg9[%c0_85, %c0_86] : memref<1x32xf32, #tpu.memory_space<vmem>>, vector<1x32xf32>
      %148 = vector.broadcast %147 : vector<1x32xf32> to vector<8x32xf32>
      %149 = arith.addf %146, %148 : vector<8x32xf32>
      %c0_87 = arith.constant 0 : index
      %c0_88 = arith.constant 0 : index
      %c0_89 = arith.constant 0 : index
      %150 = vector.load %arg5[%c0_87, %c0_88, %c0_89] : memref<1x8x32xbf16, #tpu.memory_space<vmem>>, vector<1x8x32xbf16>
      %151 = vector.shape_cast %150 : vector<1x8x32xbf16> to vector<8x32xbf16>
      %c0_90 = arith.constant 0 : index
      %c0_91 = arith.constant 0 : index
      %152 = vector.load %arg10[%c0_90, %c0_91] : memref<32x32xbf16, #tpu.memory_space<vmem>>, vector<32x32xbf16>
      %cst_92 = arith.constant dense<0.000000e+00> : vector<8x32xf32>
      %153 = tpu.matmul %151, %152, %cst_92 {dimension_numbers = #tpu.dot_dimension_numbers<[1], [0], [0], [1], [0, 0, 1, 1], [], []>} : vector<8x32xbf16>, vector<32x32xbf16>, vector<8x32xf32> -> vector<8x32xf32>
      %c0_93 = arith.constant 0 : index
      %c0_94 = arith.constant 0 : index
      %154 = vector.load %arg11[%c0_93, %c0_94] : memref<1x32xf32, #tpu.memory_space<vmem>>, vector<1x32xf32>
      %155 = vector.broadcast %154 : vector<1x32xf32> to vector<8x32xf32>
      %156 = arith.addf %153, %155 : vector<8x32xf32>
      %157 = arith.truncf %149 : vector<8x32xf32> to vector<8x32xbf16>
      %c0_95 = arith.constant 0 : index
      %c0_96 = arith.constant 0 : index
      %158 = vector.load %arg18[%c0_95, %c0_96] : memref<8x32xbf16, #tpu.memory_space<vmem>>, vector<8x32xbf16>
      tpu.vector_store %arg18[%c0_95, %c0_96], %157 {strides = array<i32>} : memref<8x32xbf16, #tpu.memory_space<vmem>>, vector<8x32xbf16>,
      %159 = arith.truncf %156 : vector<8x32xf32> to vector<8x32xbf16>
      %c0_97 = arith.constant 0 : index
      %c0_98 = arith.constant 0 : index
      %160 = vector.load %arg19[%c0_97, %c0_98] : memref<8x32xbf16, #tpu.memory_space<vmem>>, vector<8x32xbf16>
      tpu.vector_store %arg19[%c0_97, %c0_98], %159 {strides = array<i32>} : memref<8x32xbf16, #tpu.memory_space<vmem>>, vector<8x32xbf16>,
    } else {
    }
    %7 = arith.truncf %1 : vector<8x32xf32> to vector<8x32xbf16>
    %c0_6 = arith.constant 0 : index
    %c0_7 = arith.constant 0 : index
    %8 = vector.load %arg6[%c0_6, %c0_7] : memref<32x32xbf16, #tpu.memory_space<vmem>>, vector<32x32xbf16>
    %cst = arith.constant dense<0.000000e+00> : vector<8x32xf32>
    %9 = tpu.matmul %7, %8, %cst {dimension_numbers = #tpu.dot_dimension_numbers<[1], [0], [0], [1], [0, 0, 1, 1], [], []>} : vector<8x32xbf16>, vector<32x32xbf16>, vector<8x32xf32> -> vector<8x32xf32>
    %c0_8 = arith.constant 0 : index
    %c0_9 = arith.constant 0 : index
    %10 = vector.load %arg7[%c0_8, %c0_9] : memref<1x32xf32, #tpu.memory_space<vmem>>, vector<1x32xf32>
    %11 = vector.broadcast %10 : vector<1x32xf32> to vector<8x32xf32>
    %12 = arith.addf %9, %11 : vector<8x32xf32>
    %13 = vector.extract_strided_slice %12 {offsets = [0, 0], sizes = [8, 8], strides = [1, 1]} : vector<8x32xf32> to vector<8x8xf32>
    %14 = arith.truncf %13 : vector<8x8xf32> to vector<8x8xbf16>
    %c0_10 = arith.constant 0 : index
    %c0_11 = arith.constant 0 : index
    %15 = vector.load %arg18[%c0_10, %c0_11] : memref<8x32xbf16, #tpu.memory_space<vmem>>, vector<8x8xbf16>
    %c0_12 = arith.constant 0 : index
    %c0_13 = arith.constant 0 : index
    %16 = vector.load %arg19[%c0_12, %c0_13] : memref<8x32xbf16, #tpu.memory_space<vmem>>, vector<8x8xbf16>
    %cst_14 = arith.constant dense<0.000000e+00> : vector<8x8xf32>
    %17 = tpu.matmul %14, %15, %cst_14 {dimension_numbers = #tpu.dot_dimension_numbers<[1], [1], [0], [0], [0, 0, 1, 0], [], []>} : vector<8x8xbf16>, vector<8x8xbf16>, vector<8x8xf32> -> vector<8x8xf32>
    %18 = vector.broadcast %3 : vector<1x8xf32> to vector<8x8xf32>
    %19 = arith.addf %17, %18 : vector<8x8xf32>
    %cst_15 = arith.constant dense<0xFF800000> : vector<8xf32>
    %20 = vector.multi_reduction <maximumf>, %19, %cst_15 [1] : vector<8x8xf32> to vector<8xf32>
    %21 = vector.shape_cast %20 : vector<8xf32> to vector<8x1xf32>
    %22 = vector.broadcast %21 : vector<8x1xf32> to vector<8x8xf32>
    %23 = arith.subf %19, %22 : vector<8x8xf32>
    %24 = math.exp %23 : vector<8x8xf32>
    %cst_16 = arith.constant dense<0.000000e+00> : vector<8xf32>
    %25 = vector.multi_reduction <add>, %24, %cst_16 [1] : vector<8x8xf32> to vector<8xf32>
    %26 = vector.shape_cast %25 : vector<8xf32> to vector<8x1xf32>
    %27 = tpu.reciprocal %26 {approx = true} : vector<8x1xf32> -> vector<8x1xf32>
    %28 = vector.broadcast %27 : vector<8x1xf32> to vector<8x8xf32>
    %29 = arith.mulf %24, %28 : vector<8x8xf32>
    %c0_17 = arith.constant 0 : index
    %c0_18 = arith.constant 0 : index
    %c0_19 = arith.constant 0 : index
    %c0_20 = arith.constant 0 : index
    %30 = vector.load %arg17[%c0_17, %c0_18, %c0_19, %c0_20] : memref<1x4x8x8xf32, #tpu.memory_space<vmem>>, vector<1x1x8x8xf32>
    %31 = vector.shape_cast %30 : vector<1x1x8x8xf32> to vector<8x8xf32>
    %32 = vector.shape_cast %29 : vector<8x8xf32> to vector<1x1x8x8xf32>
    tpu.vector_store %arg17[%c0_17, %c0_18, %c0_19, %c0_20], %32 {strides = array<i32>} : memref<1x4x8x8xf32, #tpu.memory_space<vmem>>, vector<1x1x8x8xf32>,
    %33 = arith.truncf %29 : vector<8x8xf32> to vector<8x8xbf16>
    %cst_21 = arith.constant dense<0.000000e+00> : vector<8x8xf32>
    %34 = tpu.matmul %33, %16, %cst_21 {dimension_numbers = #tpu.dot_dimension_numbers<[1], [0], [0], [1], [0, 0, 1, 1], [], []>} : vector<8x8xbf16>, vector<8x8xbf16>, vector<8x8xf32> -> vector<8x8xf32>
    %35 = arith.truncf %34 : vector<8x8xf32> to vector<8x8xbf16>
    %c0_22 = arith.constant 0 : index
    %c0_23 = arith.constant 0 : index
    %36 = vector.load %arg20[%c0_22, %c0_23] : memref<8x32xbf16, #tpu.memory_space<vmem>>, vector<8x8xbf16>
    tpu.vector_store %arg20[%c0_22, %c0_23], %35 {strides = array<i32>} : memref<8x32xbf16, #tpu.memory_space<vmem>>, vector<8x8xbf16>,
    %37 = vector.extract_strided_slice %12 {offsets = [0, 8], sizes = [8, 8], strides = [1, 1]} : vector<8x32xf32> to vector<8x8xf32>
    %38 = arith.truncf %37 : vector<8x8xf32> to vector<8x8xbf16>
    %c0_24 = arith.constant 0 : index
    %c8 = arith.constant 8 : index
    %39 = vector.load %arg18[%c0_24, %c8] : memref<8x32xbf16, #tpu.memory_space<vmem>>, vector<8x8xbf16>
    %c0_25 = arith.constant 0 : index
    %c8_26 = arith.constant 8 : index
    %40 = vector.load %arg19[%c0_25, %c8_26] : memref<8x32xbf16, #tpu.memory_space<vmem>>, vector<8x8xbf16>
    %cst_27 = arith.constant dense<0.000000e+00> : vector<8x8xf32>
    %41 = tpu.matmul %38, %39, %cst_27 {dimension_numbers = #tpu.dot_dimension_numbers<[1], [1], [0], [0], [0, 0, 1, 0], [], []>} : vector<8x8xbf16>, vector<8x8xbf16>, vector<8x8xf32> -> vector<8x8xf32>
    %42 = vector.broadcast %3 : vector<1x8xf32> to vector<8x8xf32>
    %43 = arith.addf %41, %42 : vector<8x8xf32>
    %cst_28 = arith.constant dense<0xFF800000> : vector<8xf32>
    %44 = vector.multi_reduction <maximumf>, %43, %cst_28 [1] : vector<8x8xf32> to vector<8xf32>
    %45 = vector.shape_cast %44 : vector<8xf32> to vector<8x1xf32>
    %46 = vector.broadcast %45 : vector<8x1xf32> to vector<8x8xf32>
    %47 = arith.subf %43, %46 : vector<8x8xf32>
    %48 = math.exp %47 : vector<8x8xf32>
    %cst_29 = arith.constant dense<0.000000e+00> : vector<8xf32>
    %49 = vector.multi_reduction <add>, %48, %cst_29 [1] : vector<8x8xf32> to vector<8xf32>
    %50 = vector.shape_cast %49 : vector<8xf32> to vector<8x1xf32>
    %51 = tpu.reciprocal %50 {approx = true} : vector<8x1xf32> -> vector<8x1xf32>
    %52 = vector.broadcast %51 : vector<8x1xf32> to vector<8x8xf32>
    %53 = arith.mulf %48, %52 : vector<8x8xf32>
    %c0_30 = arith.constant 0 : index
    %c1 = arith.constant 1 : index
    %c0_31 = arith.constant 0 : index
    %c0_32 = arith.constant 0 : index
    %54 = vector.load %arg17[%c0_30, %c1, %c0_31, %c0_32] : memref<1x4x8x8xf32, #tpu.memory_space<vmem>>, vector<1x1x8x8xf32>
    %55 = vector.shape_cast %54 : vector<1x1x8x8xf32> to vector<8x8xf32>
    %56 = vector.shape_cast %53 : vector<8x8xf32> to vector<1x1x8x8xf32>
    tpu.vector_store %arg17[%c0_30, %c1, %c0_31, %c0_32], %56 {strides = array<i32>} : memref<1x4x8x8xf32, #tpu.memory_space<vmem>>, vector<1x1x8x8xf32>,
    %57 = arith.truncf %53 : vector<8x8xf32> to vector<8x8xbf16>
    %cst_33 = arith.constant dense<0.000000e+00> : vector<8x8xf32>
    %58 = tpu.matmul %57, %40, %cst_33 {dimension_numbers = #tpu.dot_dimension_numbers<[1], [0], [0], [1], [0, 0, 1, 1], [], []>} : vector<8x8xbf16>, vector<8x8xbf16>, vector<8x8xf32> -> vector<8x8xf32>
    %59 = arith.truncf %58 : vector<8x8xf32> to vector<8x8xbf16>
    %c0_34 = arith.constant 0 : index
    %c8_35 = arith.constant 8 : index
    %60 = vector.load %arg20[%c0_34, %c8_35] : memref<8x32xbf16, #tpu.memory_space<vmem>>, vector<8x8xbf16>
    tpu.vector_store %arg20[%c0_34, %c8_35], %59 {strides = array<i32>} : memref<8x32xbf16, #tpu.memory_space<vmem>>, vector<8x8xbf16>,
    %61 = vector.extract_strided_slice %12 {offsets = [0, 16], sizes = [8, 8], strides = [1, 1]} : vector<8x32xf32> to vector<8x8xf32>
    %62 = arith.truncf %61 : vector<8x8xf32> to vector<8x8xbf16>
    %c0_36 = arith.constant 0 : index
    %c16 = arith.constant 16 : index
    %63 = vector.load %arg18[%c0_36, %c16] : memref<8x32xbf16, #tpu.memory_space<vmem>>, vector<8x8xbf16>
    %c0_37 = arith.constant 0 : index
    %c16_38 = arith.constant 16 : index
    %64 = vector.load %arg19[%c0_37, %c16_38] : memref<8x32xbf16, #tpu.memory_space<vmem>>, vector<8x8xbf16>
    %cst_39 = arith.constant dense<0.000000e+00> : vector<8x8xf32>
    %65 = tpu.matmul %62, %63, %cst_39 {dimension_numbers = #tpu.dot_dimension_numbers<[1], [1], [0], [0], [0, 0, 1, 0], [], []>} : vector<8x8xbf16>, vector<8x8xbf16>, vector<8x8xf32> -> vector<8x8xf32>
    %66 = vector.broadcast %3 : vector<1x8xf32> to vector<8x8xf32>
    %67 = arith.addf %65, %66 : vector<8x8xf32>
    %cst_40 = arith.constant dense<0xFF800000> : vector<8xf32>
    %68 = vector.multi_reduction <maximumf>, %67, %cst_40 [1] : vector<8x8xf32> to vector<8xf32>
    %69 = vector.shape_cast %68 : vector<8xf32> to vector<8x1xf32>
    %70 = vector.broadcast %69 : vector<8x1xf32> to vector<8x8xf32>
    %71 = arith.subf %67, %70 : vector<8x8xf32>
    %72 = math.exp %71 : vector<8x8xf32>
    %cst_41 = arith.constant dense<0.000000e+00> : vector<8xf32>
    %73 = vector.multi_reduction <add>, %72, %cst_41 [1] : vector<8x8xf32> to vector<8xf32>
    %74 = vector.shape_cast %73 : vector<8xf32> to vector<8x1xf32>
    %75 = tpu.reciprocal %74 {approx = true} : vector<8x1xf32> -> vector<8x1xf32>
    %76 = vector.broadcast %75 : vector<8x1xf32> to vector<8x8xf32>
    %77 = arith.mulf %72, %76 : vector<8x8xf32>
    %c0_42 = arith.constant 0 : index
    %c2 = arith.constant 2 : index
    %c0_43 = arith.constant 0 : index
    %c0_44 = arith.constant 0 : index
    %78 = vector.load %arg17[%c0_42, %c2, %c0_43, %c0_44] : memref<1x4x8x8xf32, #tpu.memory_space<vmem>>, vector<1x1x8x8xf32>
    %79 = vector.shape_cast %78 : vector<1x1x8x8xf32> to vector<8x8xf32>
    %80 = vector.shape_cast %77 : vector<8x8xf32> to vector<1x1x8x8xf32>
    tpu.vector_store %arg17[%c0_42, %c2, %c0_43, %c0_44], %80 {strides = array<i32>} : memref<1x4x8x8xf32, #tpu.memory_space<vmem>>, vector<1x1x8x8xf32>,
    %81 = arith.truncf %77 : vector<8x8xf32> to vector<8x8xbf16>
    %cst_45 = arith.constant dense<0.000000e+00> : vector<8x8xf32>
    %82 = tpu.matmul %81, %64, %cst_45 {dimension_numbers = #tpu.dot_dimension_numbers<[1], [0], [0], [1], [0, 0, 1, 1], [], []>} : vector<8x8xbf16>, vector<8x8xbf16>, vector<8x8xf32> -> vector<8x8xf32>
    %83 = arith.truncf %82 : vector<8x8xf32> to vector<8x8xbf16>
    %c0_46 = arith.constant 0 : index
    %c16_47 = arith.constant 16 : index
    %84 = vector.load %arg20[%c0_46, %c16_47] : memref<8x32xbf16, #tpu.memory_space<vmem>>, vector<8x8xbf16>
    tpu.vector_store %arg20[%c0_46, %c16_47], %83 {strides = array<i32>} : memref<8x32xbf16, #tpu.memory_space<vmem>>, vector<8x8xbf16>,
    %85 = vector.extract_strided_slice %12 {offsets = [0, 24], sizes = [8, 8], strides = [1, 1]} : vector<8x32xf32> to vector<8x8xf32>
    %86 = arith.truncf %85 : vector<8x8xf32> to vector<8x8xbf16>
    %c0_48 = arith.constant 0 : index
    %c24 = arith.constant 24 : index
    %87 = vector.load %arg18[%c0_48, %c24] : memref<8x32xbf16, #tpu.memory_space<vmem>>, vector<8x8xbf16>
    %c0_49 = arith.constant 0 : index
    %c24_50 = arith.constant 24 : index
    %88 = vector.load %arg19[%c0_49, %c24_50] : memref<8x32xbf16, #tpu.memory_space<vmem>>, vector<8x8xbf16>
    %cst_51 = arith.constant dense<0.000000e+00> : vector<8x8xf32>
    %89 = tpu.matmul %86, %87, %cst_51 {dimension_numbers = #tpu.dot_dimension_numbers<[1], [1], [0], [0], [0, 0, 1, 0], [], []>} : vector<8x8xbf16>, vector<8x8xbf16>, vector<8x8xf32> -> vector<8x8xf32>
    %90 = vector.broadcast %3 : vector<1x8xf32> to vector<8x8xf32>
    %91 = arith.addf %89, %90 : vector<8x8xf32>
    %cst_52 = arith.constant dense<0xFF800000> : vector<8xf32>
    %92 = vector.multi_reduction <maximumf>, %91, %cst_52 [1] : vector<8x8xf32> to vector<8xf32>
    %93 = vector.shape_cast %92 : vector<8xf32> to vector<8x1xf32>
    %94 = vector.broadcast %93 : vector<8x1xf32> to vector<8x8xf32>
    %95 = arith.subf %91, %94 : vector<8x8xf32>
    %96 = math.exp %95 : vector<8x8xf32>
    %cst_53 = arith.constant dense<0.000000e+00> : vector<8xf32>
    %97 = vector.multi_reduction <add>, %96, %cst_53 [1] : vector<8x8xf32> to vector<8xf32>
    %98 = vector.shape_cast %97 : vector<8xf32> to vector<8x1xf32>
    %99 = tpu.reciprocal %98 {approx = true} : vector<8x1xf32> -> vector<8x1xf32>
    %100 = vector.broadcast %99 : vector<8x1xf32> to vector<8x8xf32>
    %101 = arith.mulf %96, %100 : vector<8x8xf32>
    %c0_54 = arith.constant 0 : index
    %c3 = arith.constant 3 : index
    %c0_55 = arith.constant 0 : index
    %c0_56 = arith.constant 0 : index
    %102 = vector.load %arg17[%c0_54, %c3, %c0_55, %c0_56] : memref<1x4x8x8xf32, #tpu.memory_space<vmem>>, vector<1x1x8x8xf32>
    %103 = vector.shape_cast %102 : vector<1x1x8x8xf32> to vector<8x8xf32>
    %104 = vector.shape_cast %101 : vector<8x8xf32> to vector<1x1x8x8xf32>
    tpu.vector_store %arg17[%c0_54, %c3, %c0_55, %c0_56], %104 {strides = array<i32>} : memref<1x4x8x8xf32, #tpu.memory_space<vmem>>, vector<1x1x8x8xf32>,
    %105 = arith.truncf %101 : vector<8x8xf32> to vector<8x8xbf16>
    %cst_57 = arith.constant dense<0.000000e+00> : vector<8x8xf32>
    %106 = tpu.matmul %105, %88, %cst_57 {dimension_numbers = #tpu.dot_dimension_numbers<[1], [0], [0], [1], [0, 0, 1, 1], [], []>} : vector<8x8xbf16>, vector<8x8xbf16>, vector<8x8xf32> -> vector<8x8xf32>
    %107 = arith.truncf %106 : vector<8x8xf32> to vector<8x8xbf16>
    %c0_58 = arith.constant 0 : index
    %c24_59 = arith.constant 24 : index
    %108 = vector.load %arg20[%c0_58, %c24_59] : memref<8x32xbf16, #tpu.memory_space<vmem>>, vector<8x8xbf16>
    tpu.vector_store %arg20[%c0_58, %c24_59], %107 {strides = array<i32>} : memref<8x32xbf16, #tpu.memory_space<vmem>>, vector<8x8xbf16>,
    %c0_60 = arith.constant 0 : index
    %c0_61 = arith.constant 0 : index
    %109 = vector.load %arg20[%c0_60, %c0_61] : memref<8x32xbf16, #tpu.memory_space<vmem>>, vector<8x32xbf16>
    %c0_62 = arith.constant 0 : index
    %c0_63 = arith.constant 0 : index
    %110 = vector.load %arg12[%c0_62, %c0_63] : memref<32x32xbf16, #tpu.memory_space<vmem>>, vector<32x32xbf16>
    %cst_64 = arith.constant dense<0.000000e+00> : vector<8x32xf32>
    %111 = tpu.matmul %109, %110, %cst_64 {dimension_numbers = #tpu.dot_dimension_numbers<[1], [0], [0], [1], [0, 0, 1, 1], [], []>} : vector<8x32xbf16>, vector<32x32xbf16>, vector<8x32xf32> -> vector<8x32xf32>
    %c0_65 = arith.constant 0 : index
    %c0_66 = arith.constant 0 : index
    %112 = vector.load %arg13[%c0_65, %c0_66] : memref<1x32xf32, #tpu.memory_space<vmem>>, vector<1x32xf32>
    %113 = vector.broadcast %112 : vector<1x32xf32> to vector<8x32xf32>
    %114 = arith.addf %111, %113 : vector<8x32xf32>
    %115 = arith.addf %114, %1 : vector<8x32xf32>
    %cst_67 = arith.constant dense<0.000000e+00> : vector<8xf32>
    %116 = vector.multi_reduction <add>, %115, %cst_67 [1] : vector<8x32xf32> to vector<8xf32>
    %117 = vector.shape_cast %116 : vector<8xf32> to vector<8x1xf32>
    %cst_68 = arith.constant 3.200000e+01 : f32
    %118 = vector.broadcast %cst_68 : f32 to vector<8x1xf32>
    %119 = arith.divf %117, %118 : vector<8x1xf32>
    %120 = vector.broadcast %119 : vector<8x1xf32> to vector<8x32xf32>
    %121 = arith.subf %115, %120 : vector<8x32xf32>
    %122 = arith.mulf %121, %121 : vector<8x32xf32>
    %cst_69 = arith.constant dense<0.000000e+00> : vector<8xf32>
    %123 = vector.multi_reduction <add>, %122, %cst_69 [1] : vector<8x32xf32> to vector<8xf32>
    %124 = vector.shape_cast %123 : vector<8xf32> to vector<8x1xf32>
    %cst_70 = arith.constant 3.200000e+01 : f32
    %125 = vector.broadcast %cst_70 : f32 to vector<8x1xf32>
    %126 = arith.divf %124, %125 : vector<8x1xf32>
    %127 = vector.broadcast %119 : vector<8x1xf32> to vector<8x32xf32>
    %128 = arith.subf %115, %127 : vector<8x32xf32>
    %cst_71 = arith.constant 9.99999974E-6 : f32
    %129 = vector.broadcast %cst_71 : f32 to vector<8x1xf32>
    %130 = arith.addf %126, %129 : vector<8x1xf32>
    %131 = math.rsqrt %130 : vector<8x1xf32>
    %132 = vector.broadcast %131 : vector<8x1xf32> to vector<8x32xf32>
    %133 = arith.mulf %128, %132 : vector<8x32xf32>
    %c0_72 = arith.constant 0 : index
    %c0_73 = arith.constant 0 : index
    %134 = vector.load %arg14[%c0_72, %c0_73] : memref<1x32xf32, #tpu.memory_space<vmem>>, vector<1x32xf32>
    %135 = vector.broadcast %134 : vector<1x32xf32> to vector<8x32xf32>
    %136 = arith.mulf %133, %135 : vector<8x32xf32>
    %c0_74 = arith.constant 0 : index
    %c0_75 = arith.constant 0 : index
    %137 = vector.load %arg15[%c0_74, %c0_75] : memref<1x32xf32, #tpu.memory_space<vmem>>, vector<1x32xf32>
    %138 = vector.broadcast %137 : vector<1x32xf32> to vector<8x32xf32>
    %139 = arith.addf %136, %138 : vector<8x32xf32>
    %c0_76 = arith.constant 0 : index
    %c0_77 = arith.constant 0 : index
    %c0_78 = arith.constant 0 : index
    %140 = vector.load %arg16[%c0_76, %c0_77, %c0_78] : memref<1x8x32xf32, #tpu.memory_space<vmem>>, vector<1x8x32xf32>
    %141 = vector.shape_cast %140 : vector<1x8x32xf32> to vector<8x32xf32>
    %142 = vector.shape_cast %139 : vector<8x32xf32> to vector<1x8x32xf32>
    tpu.vector_store %arg16[%c0_76, %c0_77, %c0_78], %142 {strides = array<i32>} : memref<1x8x32xf32, #tpu.memory_space<vmem>>, vector<1x8x32xf32>,
    return
  }
  func.func @transform_0(%arg0: i32, %arg1: i32) -> (i32, i32, i32) {
    %c0_i32 = arith.constant 0 : i32
    %c0_i32_0 = arith.constant 0 : i32
    %c0_i32_1 = arith.constant 0 : i32
    return %arg0, %c0_i32, %c0_i32_0 : i32, i32, i32
  }
  func.func @transform_1(%arg0: i32, %arg1: i32) -> (i32, i32, i32) {
    %c0_i32 = arith.constant 0 : i32
    %c0_i32_0 = arith.constant 0 : i32
    return %arg0, %arg1, %c0_i32 : i32, i32, i32
  }
  func.func @transform_2(%arg0: i32, %arg1: i32) -> (i32, i32, i32) {
    %c0_i32 = arith.constant 0 : i32
    %c0_i32_0 = arith.constant 0 : i32
    %c0_i32_1 = arith.constant 0 : i32
    return %arg0, %c0_i32, %c0_i32_0 : i32, i32, i32
  }
  func.func @transform_3(%arg0: i32, %arg1: i32) -> (i32, i32, i32) {
    %c0_i32 = arith.constant 0 : i32
    %c0_i32_0 = arith.constant 0 : i32
    %c0_i32_1 = arith.constant 0 : i32
    return %arg0, %c0_i32, %c0_i32_0 : i32, i32, i32
  }
  func.func @transform_4(%arg0: i32, %arg1: i32) -> (i32, i32) {
    %c0_i32 = arith.constant 0 : i32
    %c0_i32_0 = arith.constant 0 : i32
    %c0_i32_1 = arith.constant 0 : i32
    return %c0_i32, %c0_i32_0 : i32, i32
  }
  func.func @transform_5(%arg0: i32, %arg1: i32) -> (i32, i32) {
    %c0_i32 = arith.constant 0 : i32
    %c0_i32_0 = arith.constant 0 : i32
    %c0_i32_1 = arith.constant 0 : i32
    return %c0_i32, %c0_i32_0 : i32, i32
  }
  func.func @transform_6(%arg0: i32, %arg1: i32) -> (i32, i32) {
    %c0_i32 = arith.constant 0 : i32
    %c0_i32_0 = arith.constant 0 : i32
    %c0_i32_1 = arith.constant 0 : i32
    return %c0_i32, %c0_i32_0 : i32, i32
  }
  func.func @transform_7(%arg0: i32, %arg1: i32) -> (i32, i32) {
    %c0_i32 = arith.constant 0 : i32
    %c0_i32_0 = arith.constant 0 : i32
    %c0_i32_1 = arith.constant 0 : i32
    return %c0_i32, %c0_i32_0 : i32, i32
  }
  func.func @transform_8(%arg0: i32, %arg1: i32) -> (i32, i32) {
    %c0_i32 = arith.constant 0 : i32
    %c0_i32_0 = arith.constant 0 : i32
    %c0_i32_1 = arith.constant 0 : i32
    return %c0_i32, %c0_i32_0 : i32, i32
  }
  func.func @transform_9(%arg0: i32, %arg1: i32) -> (i32, i32) {
    %c0_i32 = arith.constant 0 : i32
    %c0_i32_0 = arith.constant 0 : i32
    %c0_i32_1 = arith.constant 0 : i32
    return %c0_i32, %c0_i32_0 : i32, i32
  }
  func.func @transform_10(%arg0: i32, %arg1: i32) -> (i32, i32) {
    %c0_i32 = arith.constant 0 : i32
    %c0_i32_0 = arith.constant 0 : i32
    %c0_i32_1 = arith.constant 0 : i32
    return %c0_i32, %c0_i32_0 : i32, i32
  }
  func.func @transform_11(%arg0: i32, %arg1: i32) -> (i32, i32) {
    %c0_i32 = arith.constant 0 : i32
    %c0_i32_0 = arith.constant 0 : i32
    %c0_i32_1 = arith.constant 0 : i32
    return %c0_i32, %c0_i32_0 : i32, i32
  }
  func.func @transform_12(%arg0: i32, %arg1: i32) -> (i32, i32) {
    %c0_i32 = arith.constant 0 : i32
    %c0_i32_0 = arith.constant 0 : i32
    %c0_i32_1 = arith.constant 0 : i32
    return %c0_i32, %c0_i32_0 : i32, i32
  }
  func.func @transform_13(%arg0: i32, %arg1: i32) -> (i32, i32) {
    %c0_i32 = arith.constant 0 : i32
    %c0_i32_0 = arith.constant 0 : i32
    %c0_i32_1 = arith.constant 0 : i32
    return %c0_i32, %c0_i32_0 : i32, i32
  }
  func.func @transform_14(%arg0: i32, %arg1: i32) -> (i32, i32, i32) {
    %c0_i32 = arith.constant 0 : i32
    %c0_i32_0 = arith.constant 0 : i32
    return %arg0, %arg1, %c0_i32 : i32, i32, i32
  }
  func.func @transform_15(%arg0: i32, %arg1: i32) -> (i32, i32, i32, i32) {
    %c0_i32 = arith.constant 0 : i32
    %c0_i32_0 = arith.constant 0 : i32
    %c0_i32_1 = arith.constant 0 : i32
    return %arg0, %c0_i32, %arg1, %c0_i32_0 : i32, i32, i32, i32
  }
}

</mosaic_0001>

<bundles_post_ra>
// kernel: tpu_custom_call.1
= control target key start
LH: loop header
LB: loop body
LE: loop exit
PB: predicated region body
PF: predicated region fallthrough
CT: control target
= control target key end

     0   :  { %s3070_s0 = inlined_call_operand.hbm [shape: f32[2,1,8], index: 0, kind: input, shape index: {}]   ;;  %s3071_s1 = inlined_call_operand.hbm [shape: f32[2,8,32], index: 1, kind: input, shape index: {}]   ;;  %s3072_s2 = inlined_call_operand.hbm [shape: bf16[2,8,32], index: 2, kind: input, shape index: {}]   ;;  %s3073_s3 = inlined_call_operand.hbm [shape: bf16[2,8,32], index: 3, kind: input, shape index: {}]   ;;  %s3074_s4 = inlined_call_operand.hbm [shape: bf16[32,32], index: 4, kind: input, shape index: {}]   ;;  %s3075_s5 = inlined_call_operand.vmem [shape: f32[1,32], index: 5, kind: input, shape index: {}]   ;;  %s3076_s6 = inlined_call_operand.vmem [shape: bf16[32,32], index: 6, kind: input, shape index: {}]   ;;  %s3077_s7 = inlined_call_operand.vmem [shape: f32[1,32], index: 7, kind: input, shape index: {}]   ;;  %s3078_s8 = inlined_call_operand.hbm [shape: bf16[32,32], index: 8, kind: input, shape index: {}]   ;;  %s3079_s9 = inlined_call_operand.hbm [shape: f32[1,32], index: 9, kind: input, shape index: {}]   ;;  %s3080_s10 = inlined_call_operand.vmem [shape: bf16[32,32], index: 10, kind: input, shape index: {}]   ;;  %s3081_s11 = inlined_call_operand.vmem [shape: f32[1,32], index: 11, kind: input, shape index: {}]   ;;  %s3082_s12 = inlined_call_operand.vmem [shape: f32[1,32], index: 12, kind: input, shape index: {}]   ;;  %s3083_s13 = inlined_call_operand.vmem [shape: f32[1,32], index: 13, kind: input, shape index: {}]   ;;  %s3084_s14 = inlined_call_operand.hbm [shape: f32[2,8,32], index: 14, kind: output, shape index: {0}]   ;;  %s3085_s15 = inlined_call_operand.hbm [shape: f32[2,4,8,8], index: 15, kind: output, shape index: {1}]  }
   0x1   :  { %3104 = sst [smem:[#allocation33_spill]] %s3071_s1 }
   0x2   :  { %3105 = sst [smem:[#allocation34_spill]] %s3074_s4 }
   0x3   :  { %3106 = sst [smem:[#allocation35_spill]] %s3075_s5 }
   0x4   :  { %3107 = sst [smem:[#allocation36_spill]] %s3078_s8 }
   0x5   :  { %3108 = sst [smem:[#allocation37_spill]] %s3080_s10 }
   0x6   :  { %3109 = sst [smem:[#allocation38_spill]] %s3081_s11 }
   0x7   :  { %3110 = sst [smem:[#allocation39_spill]] %s3082_s12 }
   0x8   :  { %3111 = sst [smem:[#allocation40_spill]] %s3083_s13 }
   0x9   :  { %3112 = sst [smem:[#allocation41_spill]] %s3084_s14 }
   0xa   :  { %3113 = sst [smem:[#allocation42_spill]] %s3085_s15 }
   0xb   :  { %21 = vsyncpa [#allocation6], 0 }
   0xc   :  { %23 = vsyncpa [#allocation6 + $0x1], 0 }
   0xd   :  { %24 = vsyncpa [#allocation9], 0 }
   0xe   :  { %26 = vsyncpa [#allocation9 + $0x1], 0 }
   0xf   :  { %27 = vsyncpa [#allocation12], 0 }
  0x10   :  { %29 = vsyncpa [#allocation12 + $0x1], 0 }
  0x11   :  { %30 = vsyncpa [#allocation15], 0 }
  0x12   :  { %31 = vsyncpa [#allocation7], 0 }
  0x13   :  { %33 = vsyncpa [#allocation7 + $0x1], 0 }
  0x14   :  { %34 = vsyncpa [#allocation19], 0 }
  0x15   :  { %36 = vsyncpa [#allocation19 + $0x1], 0  ;;  %s2522_s18 = smov 0   ;;  %s2524_s19 = smov 0  }
  0x16   :  { %s2526_s20 = smov 0   ;;  %s2528_s21 = smov 0  }
  0x17   :  { %s2530_s22 = smov 0   ;;  %s2532_s23 = smov 0  }
  0x18 LB: > { %3114 = sst [smem:[#allocation27_spill]] %s2400_s18  ;;  %s2553_s24 = sadd.s32 4294967295, %s2420_s23   ;;  %s2420_s23 = sphi %s2532_s23, %s42_s23   ;;  %s2416_s22 = sphi %s2530_s22, %s3164_s22   ;;  %s2412_s21 = sphi %s2528_s21, %s3163_s21   ;;  %s2408_s20 = sphi %s2526_s20, %s3159_s20   ;;  %s2404_s19 = sphi %s2524_s19, %s3162_s19   ;;  %s2400_s18 = sphi %s2522_s18, %s3161_s18  }
  0x19   : > { %3115 = sst [smem:[#allocation28_spill]] %s2408_s20  ;;  %s1750_s25 = sadd.s32 4294967294, %s2420_s23  }
  0x1a   : > { %3116 = sst [smem:[#allocation29_spill]] %s2412_s21  ;;  %p74_p0 = scmp.ne.s32.totalorder %s2404_s19, %s2400_s18 }
  0x1b   : > { %p3090_p1 = scmp.eq.s32.totalorder %s2553_s24, 0  ;;  %p396_p3 = scmp.eq.s32.totalorder %s1750_s25, 1 }
  0x1c   : > { %p1751_p5 = scmp.ge.s32.totalorder %s2420_s23, 1  ;;  %p431_p7 = scmp.lt.s32.totalorder %s2420_s23, 3 }
  0x1d   : > { %p2562_p4 = por %p3090_p1, %p74_p0  ;;  %p2567_p6 = por %p396_p3, %p74_p0 }
  0x1e   : > { %p2572_p8 = pnand %p1751_p5, %p431_p7  ;;  %s2422_s29 = smov [#allocation13]  }
  0x1f   : > { %s3117_s26 = scalar_select %p2562_p4, 1, 0 }
  0x20   : > { %s3118_s27 = scalar_select %p2567_p6, 1, 0 }
  0x21   : > { %s3120_s28 = scalar_select %p2572_p8, 1, 0 }
  0x22   : > { %3119 = sst [smem:[#allocation30_spill]] %s3118_s27  ;;  %s443_s30 = sshll.u32 %s2422_s29, 4  ;;  %s2576_s30 = int_to_ptr.vmem [resolvable:$true] %s443_s30 }
  0x23   : > { %p1954_p9 = pneg %p2572_p8  ;;  %s2423_s17 = smov [#allocation14]  }
  0x24   : > { %s465_s25 = sshll.u32 %s2423_s17, 4  ;;  %s3122_s4 = sld [smem:[#allocation34_spill]]  ;;  %s2587_s25 = int_to_ptr.vmem [resolvable:$true] %s465_s25 }
  0x25   : > { %p2583_p11 = pnand %p1954_p9, %p3090_p1 }
  0x27   : > { %s3121_s16 = scalar_select %p2583_p11, 1, 0 }
  0x28   : > { %p2597_p13 = pneg %p2583_p11 }
  0x2a   : > { %s2086_s14 = scalar_lea.hbm %s3122_s4, 256 }
  0x2b   : > { %p2087_p12 = scmp.ne.s32.totalorder %s3122_s4, %s2086_s14  ;;  %p2093_p5 = scmp.lt.u32.totalorder %s2086_s14, %s3122_s4 }
  0x2c   : > { %s3123_s12 = scalar_select %p2597_p13, 1, 0 }
  0x2d   : > { %p2089_p0 = pnand %p2597_p13, %p2087_p12 }
  0x2f   : > { %p2090_p3 = pneg %p2089_p0 }
  0x31   : > { %p2095_p7 = pnand %p2093_p5, %p2090_p3 }
  0x33   : > { %2098 = shalt.err (!%p2095_p7)
}
  0x34   : > { %s2099_s13 = scalar_lea.vmem %s2576_s30, 256  ;;  %p2107_p2 = scmp.lt.s32.totalorder %s2576_s30, %s2576_s30 }
  0x35   : > { %p2100_p9 = scmp.ne.s32.totalorder %s2576_s30, %s2099_s13  ;;  %p2108_p6 = scmp.lt.s32.totalorder %s2099_s13, %s2099_s13 }
  0x37   : > { %p2102_p10 = pnand %p2100_p9, %p2597_p13  ;;  %p2109_p12 = por %p2108_p6, %p2107_p2 }
  0x39   : > { %p2103_p1 = pneg %p2102_p10 }
  0x3b   : > { %p2110_p0 = pnand %p2109_p12, %p2103_p1 }
  0x3d   : > { %2113 = shalt.err (!%p2110_p0)
}
  0x3e   : > { %s2424_s18 = smov 64   ;;  %s2425_s14 = smov 4  }
  0x3f   : > { %1957 = dma.hbm_to_vmem [thread:$0]  (!%p2583_p11), %s3122_s4, 256, %s2576_s30, [#allocation12], %s2424_s18, %s2424_s18, %s2425_s14  }
  0x40   : > { %s3124_s8 = sld [smem:[#allocation36_spill]] }
  0x46   : > { %s2114_s21 = scalar_lea.hbm %s3124_s8, 256 }
  0x47   : > { %p2115_p2 = scmp.ne.s32.totalorder %s3124_s8, %s2114_s21  ;;  %p2121_p10 = scmp.lt.u32.totalorder %s2114_s21, %s3124_s8 }
  0x49   : > { %p2117_p1 = pnand %p2115_p2, %p2597_p13 }
  0x4b   : > { %p2118_p6 = pneg %p2117_p1 }
  0x4d   : > { %p2123_p3 = pnand %p2121_p10, %p2118_p6 }
  0x4f   : > { %2126 = shalt.err (!%p2123_p3)
}
  0x50   : > { %s2127_s30 = scalar_lea.vmem %s2587_s25, 256  ;;  %p2135_p12 = scmp.lt.s32.totalorder %s2587_s25, %s2587_s25 }
  0x51   : > { %p2128_p5 = scmp.ne.s32.totalorder %s2587_s25, %s2127_s30  ;;  %p2136_p0 = scmp.lt.s32.totalorder %s2127_s30, %s2127_s30 }
  0x53   : > { %p2130_p7 = pnand %p2128_p5, %p2597_p13  ;;  %p2137_p2 = por %p2136_p0, %p2135_p12 }
  0x55   : > { %p2131_p9 = pneg %p2130_p7 }
  0x57   : > { %p2138_p1 = pnand %p2137_p2, %p2131_p9 }
  0x59   : > { %2141 = shalt.err (!%p2138_p1)
}
  0x5a   : > { %1960 = dma.hbm_to_vmem [thread:$0]  (!%p2583_p11), %s3124_s8, 256, %s2587_s25, [#allocation15], %s2424_s18, %s2424_s18, %s2425_s14  }
  0x5b   : > { %s54_s11 = sadd.s32 1, %s2416_s22  ;;  %s61_s21 = sadd.s32 1, %s2408_s20 }
  0x5c   : > { %p56_p6 = scmp.ge.s32.totalorder %s54_s11, 2  ;;  %p68_p10 = scmp.ne.s32.totalorder %s2408_s20, %s2404_s19 }
  0x5d   : > { %p69_p3 = scmp.eq.s32.totalorder %s2420_s23, 0  ;;  %p1987_p5 = scmp.lt.s32.totalorder %s2420_s23, 2 }
  0x5e   : > { %s3166_s11 = smov (%p56_p6, %s54_s11), 0  ;;  %p3126_p9 = scmp.eq.s32.totalorder %s2553_s24, 1 }
  0x5f   : > { %3125 = sst [smem:[#allocation31_spill]] %s3166_s11  ;;  %p70_p7 = por %p69_p3, %p68_p10 }
  0x60   : > { %p2651_p12 = por %p3126_p9, %p68_p10  ;;  %s58_s27 = ssub.s32 %s2416_s22, %s3166_s11 }
  0x61   : > { %s2658_s25 = sand.u32 1, %s2408_s20   ;;  %p59_p0 = scmp.eq.s32.totalorder %s58_s27, 0 }
  0x62   : > { %s3127_s15 = scalar_select %p2651_p12, 1, 0 }
  0x63   : > { %p2660_p2 = pnand %p1987_p5, %p70_p7  ;;  %s3096_s14 = sand.u32 1, %s2420_s23  }
  0x64   : > { %s1757_s29 = sshll.u32 %s2658_s25, 3  ;;  %s1758_s13 = sshll.u32 %s2416_s22, 7 }
  0x65   : > { %s3128_s18 = scalar_select %p2660_p2, 1, 0 }
  0x66   : > { %s2667_s17 = scalar_select %p59_p0, %s2408_s20, %s61_s21  }
  0x67   : > { %s3130_s1 = sld [smem:[#allocation33_spill]]  ;;  %s523_s27 = scalar_lea.vmem [#allocation8], %s1757_s29 }
  0x68   : > { %3129 = sst [smem:[#allocation32_spill]] %s2667_s17  ;;  %s531_s4 = sshll.u32 %s523_s27, 4  ;;  %s2675_s4 = int_to_ptr.vmem [resolvable:$true] %s531_s4 }
  0x69   : > { %s2679_s8 = scalar_lea.sflag [#allocation9], %s3096_s14  ;;  %p2685_p6 = pneg %p2660_p2 }
  0x6d   : > { %s2673_s10 = scalar_lea.hbm %s3130_s1, %s1758_s13  ;;  %s2147_s29 = scalar_lea.hbm %s3130_s1, 256 }
  0x6e   : > { %s2142_s11 = scalar_lea.hbm %s2673_s10, 128  ;;  %p2148_p5 = scmp.lt.u32.totalorder %s2673_s10, %s3130_s1 }
  0x6f   : > { %p2143_p1 = scmp.ne.s32.totalorder %s2673_s10, %s2142_s11  ;;  %p2149_p7 = scmp.lt.u32.totalorder %s2147_s29, %s2142_s11 }
  0x70   : > { %p2151_p0 = scmp.lt.u32.totalorder %s2142_s11, %s2673_s10 }
  0x71   : > { %p2145_p10 = pnand %p2685_p6, %p2143_p1  ;;  %p2150_p9 = por %p2149_p7, %p2148_p5 }
  0x73   : > { %p2146_p3 = pneg %p2145_p10  ;;  %p2152_p12 = por %p2151_p0, %p2150_p9 }
  0x75   : > { %p2153_p4 = pnand %p2152_p12, %p2146_p3 }
  0x77   : > { %2156 = shalt.err (!%p2153_p4)
}
  0x78   : > { %s2157_s14 = scalar_lea.vmem %s2675_s4, 128  ;;  %s2426_s13 = smov [#allocation8]  }
  0x79   : > { %p2158_p1 = scmp.ne.s32.totalorder %s2675_s4, %s2157_s14  ;;  %s2162_s30 = sshll.u32 %s2426_s13, 4  ;;  %s2163_s30 = int_to_ptr.vmem [resolvable:$false] %s2162_s30 }
  0x7a   : > { %s2164_s5 = scalar_lea.vmem %s2163_s30, 256  ;;  %p2165_p11 = scmp.lt.s32.totalorder %s2675_s4, %s2163_s30 }
  0x7b   : > { %p2160_p10 = pnand %p2158_p1, %p2685_p6  ;;  %p2166_p13 = scmp.lt.s32.totalorder %s2164_s5, %s2157_s14 }
  0x7d   : > { %p2161_p8 = pneg %p2160_p10  ;;  %p2167_p5 = por %p2166_p13, %p2165_p11 }
  0x7f   : > { %p2168_p7 = pnand %p2167_p5, %p2161_p8 }
  0x81   : > { %2171 = shalt.err (!%p2168_p7)
}
  0x82   : > { %1970 = dma.hbm_to_vmem [thread:$0]  (!%p2660_p2), %s2673_s10, 128, %s2675_s4, %s2679_s8  }
  0x83   : > { %s2427_s11 = smov [#allocation16]   ;;  %s1756_s27 = sshll.u32 %s2416_s22, 4 }
  0x84   : > { %s479_s29 = sshll.u32 %s2427_s11, 4  ;;  %s2172_s30 = scalar_lea.hbm %s3079_s9, 16  ;;  %s480_s29 = int_to_ptr.vmem [resolvable:$true] %s479_s29 }
  0x85   : > { %p2173_p4 = scmp.ne.s32.totalorder %s3079_s9, %s2172_s30  ;;  %p3132_p8 = scmp.ne.s32.totalorder %s3123_s12, 0 }
  0x86   : > { %p2179_p12 = scmp.lt.u32.totalorder %s2172_s30, %s3079_s9 }
  0x87   : > { %p2175_p11 = pnand %p2173_p4, %p3132_p8 }
  0x89   : > { %p2176_p13 = pneg %p2175_p11 }
  0x8b   : > { %p2181_p3 = pnand %p2179_p12, %p2176_p13 }
  0x8d   : > { %2184 = shalt.err (!%p2181_p3)
}
  0x8e   : > { %s2185_s4 = scalar_lea.vmem %s480_s29, 16  ;;  %s2192_s1 = scalar_lea.vmem %s480_s29, 32 }
  0x8f   : > { %p2186_p9 = scmp.ne.s32.totalorder %s480_s29, %s2185_s4  ;;  %p2193_p10 = scmp.lt.s32.totalorder %s480_s29, %s480_s29 }
  0x90   : > { %p2194_p5 = scmp.lt.s32.totalorder %s2192_s1, %s2185_s4 }
  0x91   : > { %p2188_p0 = pnand %p2186_p9, %p3132_p8 }
  0x92   : > { %p2195_p7 = por %p2194_p5, %p2193_p10 }
  0x93   : > { %p2189_p1 = pneg %p2188_p0 }
  0x95   : > { %p2196_p2 = pnand %p2195_p7, %p2189_p1 }
  0x97   : > { %2199 = shalt.err (!%p2196_p2)
}
  0x98   : > { %p3133_p4 = scmp.ne.s32.totalorder %s3121_s16, 0  ;;  %s2731_s17 = scalar_lea.hbm %s3070_s0, %s1756_s27 }
  0x99   : > { %s505_s13 = scalar_lea.vmem [#allocation5], %s2658_s25  ;;  %s1759_s16 = sshll.u32 %s2658_s25, 2 }
  0x9a   : > { %1963 = dma.hbm_to_vmem [thread:$0]  (!%p3133_p4), %s3079_s9, 16, %s480_s29, [#allocation15]  }
  0x9b   : > { %s512_s30 = sshll.u32 %s505_s13, 4  ;;  %s503_s14 = scalar_lea.sflag [#allocation6], %s2658_s25  ;;  %s2734_s30 = int_to_ptr.vmem [resolvable:$true] %s512_s30 }
  0x9c   : > { %s2200_s5 = scalar_lea.hbm %s2731_s17, 16  ;;  %s2205_s27 = scalar_lea.hbm %s3070_s0, 32 }
  0x9d   : > { %p2201_p2 = scmp.ne.s32.totalorder %s2731_s17, %s2200_s5  ;;  %p2206_p13 = scmp.lt.u32.totalorder %s2731_s17, %s3070_s0 }
  0x9e   : > { %p2207_p12 = scmp.lt.u32.totalorder %s2205_s27, %s2200_s5  ;;  %p2209_p9 = scmp.lt.u32.totalorder %s2200_s5, %s2731_s17 }
  0x9f   : > { %p2203_p8 = pnand %p2201_p2, %p2685_p6 }
  0xa0   : > { %p2208_p3 = por %p2207_p12, %p2206_p13 }
  0xa1   : > { %p2204_p11 = pneg %p2203_p8 }
  0xa2   : > { %p2210_p0 = por %p2209_p9, %p2208_p3 }
  0xa4   : > { %p2211_p1 = pnand %p2210_p0, %p2204_p11 }
  0xa6   : > { %2214 = shalt.err (!%p2211_p1)
}
  0xa7   : > { %s2215_s11 = scalar_lea.vmem %s2734_s30, 16  ;;  %s2428_s20 = smov [#allocation5]  }
  0xa8   : > { %p2216_p10 = scmp.ne.s32.totalorder %s2734_s30, %s2215_s11  ;;  %s2220_s12 = sshll.u32 %s2428_s20, 4  ;;  %s2221_s12 = int_to_ptr.vmem [resolvable:$false] %s2220_s12 }
  0xa9   : > { %s2222_s13 = scalar_lea.vmem %s2221_s12, 32  ;;  %p2223_p4 = scmp.lt.s32.totalorder %s2734_s30, %s2221_s12 }
  0xaa   : > { %p2218_p5 = pnand %p2216_p10, %p2685_p6  ;;  %p2224_p2 = scmp.lt.s32.totalorder %s2222_s13, %s2215_s11 }
  0xac   : > { %p2219_p7 = pneg %p2218_p5  ;;  %p2225_p8 = por %p2224_p2, %p2223_p4 }
  0xae   : > { %p2226_p13 = pnand %p2225_p8, %p2219_p7 }
  0xb0   : > { %2229 = shalt.err (!%p2226_p13)
}
  0xb1   : > { %p3134_p11 = scmp.ne.s32.totalorder %s3128_s18, 0  ;;  %s1760_s5 = sshll.u32 %s2416_s22, 6 }
  0xb2   : > { %s2765_s27 = scalar_lea.hbm %s3072_s2, %s1760_s5  ;;  %s542_s1 = scalar_lea.vmem [#allocation10], %s1759_s16 }
  0xb3   : > { %1967 = dma.hbm_to_vmem [thread:$0]  (!%p3134_p11), %s2731_s17, 16, %s2734_s30, %s503_s14  }
  0xb4   : > { %s549_s10 = sshll.u32 %s542_s1, 4  ;;  %s2230_s11 = scalar_lea.hbm %s2765_s27, 64  ;;  %s550_s10 = int_to_ptr.vmem [resolvable:$true] %s549_s10 }
  0xb5   : > { %p2231_p12 = scmp.ne.s32.totalorder %s2765_s27, %s2230_s11  ;;  %s2235_s14 = scalar_lea.hbm %s3072_s2, 128 }
  0xb6   : > { %p2236_p0 = scmp.lt.u32.totalorder %s2765_s27, %s3072_s2  ;;  %p2237_p1 = scmp.lt.u32.totalorder %s2235_s14, %s2230_s11 }
  0xb7   : > { %p2233_p3 = pnand %p2231_p12, %p2685_p6  ;;  %p2239_p5 = scmp.lt.u32.totalorder %s2230_s11, %s2765_s27 }
  0xb8   : > { %p2238_p10 = por %p2237_p1, %p2236_p0 }
  0xb9   : > { %p2234_p9 = pneg %p2233_p3 }
  0xba   : > { %p2240_p7 = por %p2239_p5, %p2238_p10 }
  0xbc   : > { %p2241_p4 = pnand %p2240_p7, %p2234_p9 }
  0xbe   : > { %2244 = shalt.err (!%p2241_p4)
}
  0xbf   : > { %s2245_s13 = scalar_lea.vmem %s550_s10, 64  ;;  %s2429_s29 = smov [#allocation10]  }
  0xc0   : > { %p2246_p2 = scmp.ne.s32.totalorder %s550_s10, %s2245_s13  ;;  %s2250_s4 = sshll.u32 %s2429_s29, 4  ;;  %s2251_s4 = int_to_ptr.vmem [resolvable:$false] %s2250_s4 }
  0xc1   : > { %s2252_s1 = scalar_lea.vmem %s2251_s4, 128  ;;  %p2253_p12 = scmp.lt.s32.totalorder %s550_s10, %s2251_s4 }
  0xc2   : > { %p2248_p8 = pnand %p2246_p2, %p2685_p6  ;;  %p2254_p3 = scmp.lt.s32.totalorder %s2252_s1, %s2245_s13 }
  0xc4   : > { %p2249_p13 = pneg %p2248_p8  ;;  %p2255_p11 = por %p2254_p3, %p2253_p12 }
  0xc6   : > { %p2256_p0 = pnand %p2255_p11, %p2249_p13 }
  0xc8   : > { %2259 = shalt.err (!%p2256_p0)
}
  0xc9   : > { %p3135_p1 = scmp.ne.s32.totalorder %s3128_s18, 0  ;;  %s2792_s30 = scalar_lea.hbm %s3073_s3, %s1760_s5 }
  0xca   : > { %s560_s14 = scalar_lea.vmem [#allocation11], %s1759_s16  ;;  %s3136_s12 = sand.u32 1, %s2420_s23  }
  0xcb   : > { %1973 = dma.hbm_to_vmem [thread:$0]  (!%p3135_p1), %s2765_s27, 64, %s550_s10, %s2679_s8  }
  0xcc   : > { %s567_s20 = sshll.u32 %s560_s14, 4  ;;  %s557_s13 = scalar_lea.sflag [#allocation12], %s3136_s12  ;;  %s568_s20 = int_to_ptr.vmem [resolvable:$true] %s567_s20 }
  0xcd   : > { %s2260_s29 = scalar_lea.hbm %s2792_s30, 64  ;;  %s2265_s5 = scalar_lea.hbm %s3073_s3, 128 }
  0xce   : > { %p2261_p11 = scmp.ne.s32.totalorder %s2792_s30, %s2260_s29  ;;  %p2266_p5 = scmp.lt.u32.totalorder %s2792_s30, %s3073_s3 }
  0xcf   : > { %p2267_p7 = scmp.lt.u32.totalorder %s2265_s5, %s2260_s29  ;;  %p2269_p2 = scmp.lt.u32.totalorder %s2260_s29, %s2792_s30 }
  0xd0   : > { %p2263_p9 = pnand %p2261_p11, %p2685_p6 }
  0xd1   : > { %p2268_p4 = por %p2267_p7, %p2266_p5 }
  0xd2   : > { %p2264_p10 = pneg %p2263_p9 }
  0xd3   : > { %p2270_p8 = por %p2269_p2, %p2268_p4 }
  0xd5   : > { %p2271_p13 = pnand %p2270_p8, %p2264_p10 }
  0xd7   : > { %2274 = shalt.err (!%p2271_p13)
}
  0xd8   : > { %s2275_s16 = scalar_lea.vmem %s568_s20, 64  ;;  %s2430_s4 = smov [#allocation11]  }
  0xd9   : > { %p2276_p12 = scmp.ne.s32.totalorder %s568_s20, %s2275_s16  ;;  %s2280_s1 = sshll.u32 %s2430_s4, 4  ;;  %s2281_s1 = int_to_ptr.vmem [resolvable:$false] %s2280_s1 }
  0xda   : > { %s2282_s11 = scalar_lea.vmem %s2281_s1, 128  ;;  %p2283_p11 = scmp.lt.s32.totalorder %s568_s20, %s2281_s1 }
  0xdb   : > { %p2278_p3 = pnand %p2276_p12, %p2685_p6  ;;  %p2284_p9 = scmp.lt.s32.totalorder %s2282_s11, %s2275_s16 }
  0xdd   : > { %p2279_p0 = pneg %p2278_p3  ;;  %p2285_p1 = por %p2284_p9, %p2283_p11 }
  0xdf   : > { %p2286_p5 = pnand %p2285_p1, %p2279_p0 }
  0xe1   : > { %2289 = shalt.err (!%p2286_p5)
}
  0xe2   : > { %p3137_p7 = scmp.ne.s32.totalorder %s3128_s18, 0  ;;  %p3138_p10 = scmp.ne.s32.totalorder %s3120_s28, 0 }
  0xe3   : > { %s2818_s21 = sand.u32 (!%p3138_p10), 1, %s2404_s19   ;;  %p3139_p6 = scmp.ne.s32.totalorder (!%p3138_p10), %s3117_s26, 0 }
  0xe4   : > { %1976 = dma.hbm_to_vmem [thread:$0]  (!%p3137_p7), %s2792_s30, 64, %s568_s20, %s557_s13  }
  0xe5   : > { %576 = sbr.rel (%p3138_p10) target bundleno = 2035 (0x7f3), region = 76  ;;  %s579_s17 = scalar_lea.sflag (!%p3138_p10), [#allocation6], %s2818_s21 }
  0xe6   : > { %s581_s14 = scalar_lea.vmem (!%p3138_p10), [#allocation5], %s2818_s21 }
  0xec   : > { %2371 = dma.done.wait (%p3139_p6), %s579_s17, 16  }
  0xed   : > { %2373 = vsyncadd (%p3139_p6), %s579_s17, 4294967280  ;;  %s586_s18 = sand.u32 1, %s2553_s24   ;;  %s1764_s28 = sshll.u32 %s2818_s21, 3 }
  0xee   : > { %s587_s30 = scalar_lea.sflag [#allocation9], %s586_s18  ;;  %s2830_s20 = scalar_lea.vmem [#allocation8], %s1764_s28 }
  0xef   : > { %2375 = dma.done.wait (%p3139_p6), %s587_s30, 192  }
  0xf0   : > { %2377 = vsyncadd (%p3139_p6), %s587_s30, 4294967104  ;;  %s1765_s12 = sshll.u32 %s2818_s21, 2  ;;  %s605_s29 = scalar_lea.sflag [#allocation12], %s586_s18 }
  0xf1   : > { %s599_s13 = scalar_lea.vmem [#allocation10], %s1765_s12  ;;  %s2837_s8 = scalar_lea.vmem [#allocation11], %s1765_s12 }
  0xf2   : > { %2379 = dma.done.wait (%p3139_p6), %s605_s29, 64  }
  0xf3   : > { %2381 = vsyncadd (%p3139_p6), %s605_s29, 4294967232  ;;  %p3140_p1 = scmp.eq.s32.totalorder %s2553_s24, 0 }
  0xf5   : > { %2383 = dma.done.wait (%p3140_p1), [#allocation12], 256   ;;  %p3141_p4 = pmov %p3140_p1 }
  0xf6   : > { %p3142_p2 = pmov %p3140_p1 }
  0xf7   : > { %2385 = vsyncadd (%p3141_p4), [#allocation12], 4294967040 }
  0xf8   : > { %2387 = dma.done.wait (%p3142_p2), [#allocation15], 272   ;;  %p3143_p8 = pmov %p3140_p1 }
  0xf9   : > { %v2431_v0 = vmov 0.0   ;;  %vm2432_vm0 = vmmov 0   ;;  %v2054_v1 = vld [vmem:[%s3076_s6] sm:$0xff]   ;;  %v2055_v2 = vld [vmem:[%s3076_s6 + $0x8] sm:$0xff]   ;;  %vm717_vm1 = vcmask 261120   ;;  %v2057_v5 = vld [vmem:[#allocation13 + $0x8] sm:$0xff]  }
  0xfa   : > { %2389 = vsyncadd (%p3143_p8), [#allocation15], 4294967024  ;;  %1850 = vmatprep.subr.bf16.mxu0 %v2431_v0  ;;  %1854 = vmatprep.mubr.msk.bf16.mxu0 %vm2432_vm0, %v2431_v0  ;;  %v693_v3 = vld [vmem:[%s599_s13] sm:$0xf]  ;;  %v2056_v4 = vld [vmem:[#allocation13] sm:$0xff]   ;;  %vm829_vm2 = vcmask 257024  }
  0xfb   : > { %1858 = vmatprep.subr.bf16.mxu1 %v2431_v0  ;;  %1862 = vmatprep.mubr.msk.bf16.mxu1 %vm2432_vm0, %v2431_v0  ;;  %v2869_v6 = vld [vmem:[%s2830_s20] sm:$0xff]  ;;  %v2058_v8 = vld [vmem:[#allocation14] sm:$0xff]   ;;  %v2059_v9 = vld [vmem:[#allocation14 + $0x8] sm:$0xff]   ;;  %s3144_s1 = sld [smem:[#allocation35_spill]]  ;;  %vm910_vm3 = vcmask 64512   ;;  %s2433_s11 = smov 112  }
  0xfc   : > { %1851 = vmatpush3.bf16.msra.mxu0 %v2054_v1  ;;  %v833_v7 = vpack.c.bf16 %v2869_v6, %v2869_v6  ;;  %1859 = vmatpush3.bf16.msra.mxu1 %v2058_v8  ;;  %v761_v10 = vld [vmem:[%s2837_s8] sm:$0xf]  ;;  %v1772_v11 = vld [vmem:[%s3077_s7] ss:$0 sm:$0xff]  ;;  %s2434_s17 = smov 120   ;;  %s2435_s18 = smov 104  }
  0xfd   : > { %1852 = vmatprep.subr.bf16.mxu0 %v2431_v0  ;;  %1860 = vmatprep.subr.bf16.mxu1 %v2431_v0  ;;  %v1776_v30 = vld [vmem:[#allocation16] ss:$0 sm:$0xff]  ;;  %vm973_vm4 = vcmask 1043456   ;;  %v1784_v48 = vld [vmem:[%s581_s14] ss:$0 sm:$0xff]  ;;  %s1771_s14 = sshll.u32 %s2818_s21, 5 }
  0xfe   : > { %s2933_s30 = scalar_lea.vmem [#allocation18], %s1771_s14  ;;  %vm1018_vm5 = vcmask 60416   ;;  %s2436_s20 = smov 8   ;;  %vm1148_vm6 = vcmask 126016   ;;  %vm1277_vm7 = vcmask 191616   ;;  %vm1406_vm8 = vcmask 257216  }
  0xff   : > { %s3145_s29 = sld [smem:[#allocation37_spill]]  ;;  %s2437_s27 = smov 16  }
 0x100   : > { %1853 = vmatpush3.bf16.msra.mxu0 %v2055_v2  ;;  %1861 = vmatpush3.bf16.msra.mxu1 %v2059_v9  ;;  %s2438_s24 = smov 24   ;;  %s3146_s25 = sld [smem:[#allocation38_spill]] }
 0x101   : > { %1866 = vmatprep.subr.bf16.mxu0 %v2431_v0  ;;  %1874 = vmatprep.subr.bf16.mxu1 %v2431_v0  ;;  %v1780_v18 = vld [vmem:[%s3144_s1] ss:$0 sm:$0xff]  ;;  %s3147_s16 = sld [smem:[#allocation29_spill]]  ;;  %s1541_s1 = sshll.u32 %s2933_s30, 4  ;;  %s2981_s1 = int_to_ptr.vmem [resolvable:$true] %s1541_s1 }
 0x102   : > { %s1513_s13 = scalar_lea.sflag [#allocation19], %s2818_s21  ;;  %s2290_s8 = scalar_lea.vmem %s2981_s1, 512 }
 0x103   : > { %1855 = vmatmul.mubr.msk.bf16.vlgmr.msra.gmra.mrb[0].mxu0 %vm717_vm1, %v693_v3  ;;  %1863 = vmatmul.mubr.msk.bf16.vlgmr.msra.gmra.mrb[0].mxu1 %vm717_vm1, %v761_v10  ;;  %p2291_p13 = scmp.ne.s32.totalorder %s2981_s1, %s2290_s8  ;;  %p3150_p12 = scmp.ne.s32.totalorder %s3127_s15, 0 }
 0x104   : > { %1867 = vmatpush3.bf16.msra.mxu0 %v2056_v4  ;;  %1870 = vmatprep.mubr.msk.bf16.mxu0 %vm2432_vm0, %v2431_v0  ;;  %s2439_s26 = smov [#allocation18]  }
 0x105   : > { %1868 = vmatprep.subr.bf16.mxu0 %v2431_v0  ;;  %1876 = vmatprep.mubr.msk.bf16.mxu1 %vm2432_vm0, %v2431_v0  ;;  %p2292_p3 = pnand %p2291_p13, %p3150_p12 }
 0x107   : > { %s1821_s4 = sshll.u32 %s3147_s16, 9  ;;  %p2293_p0 = pneg %p2292_p3 }
 0x108   : > { %1869 = vmatpush3.bf16.msra.mxu0 %v2057_v5 }
 0x109   : > { %1880 = vmatprep.subr.bf16.mxu0 %v2431_v0 }
 0x10b   : > { %1871 = vmatmul.mubr.msk.bf16.vlgmr.msra.gmra.mrb[4].mxu0 %vm717_vm1, %v833_v7 }
 0x10c   : > { %1882 = vmatprep.mubr.msk.bf16.mxu0 %vm2432_vm0, %v2431_v0 }
 0x1d6   : > { %v755_v12 = vpop.f32.mrb[0].mxu0  ;;  %v822_v31 = vpop.f32.mrb[0].mxu1 }
 0x1d7   : > { %v756_v13 = vadd.f32 %v1772_v11, %v755_v12  ;;  %v1856_v14 = vpop.f32.mrb[1].mxu0  ;;  %v823_v32 = vadd.f32 %v1776_v30, %v822_v31  ;;  %v1864_v33 = vpop.f32.mrb[1].mxu1 }
 0x1d8   : > { %v758_v15 = vpop.f32.mrb[2].mxu0  ;;  %v825_v34 = vpop.f32.mrb[2].mxu1 }
 0x1d9   : > { %v828_v16 = vpack.c.bf16 %v756_v13, %v756_v13  ;;  %v1857_v17 = vpop.f32.mrb[3].mxu0  ;;  %v831_v35 = vpack.c.bf16 %v823_v32, %v823_v32  ;;  %v1865_v36 = vpop.f32.mrb[3].mxu1 }
 0x1db   : > { %830 = vst.msk [vmem:[#allocation2] sm:$0xf] %vm829_vm2, %v828_v16  ;;  %832 = vst.msk [vmem:[#allocation3] sm:$0xf] %vm829_vm2, %v831_v35 }
 0x1de   : > { %v895_v19 = vpop.f32.mrb[4].mxu0 }
 0x1df   : > { %v1872_v20 = vpop.f32.mrb[5].mxu0  ;;  %v896_v21 = vadd.f32 %v1780_v18, %v895_v19 }
 0x1e0   : > { %v898_v22 = vpop.f32.mrb[6].mxu0 }
 0x1e1   : > { %v1873_v23 = vpop.f32.mrb[7].mxu0  ;;  %v901_v28 = vpack.c.bf16 %v896_v21, %v896_v21 }
 0x1e2   : > { %v902_v24 = vld [vmem:[#allocation2] sm:$0xf]  ;;  %v903_v37 = vld [vmem:[#allocation3] sm:$0xf] }
 0x1e3   : > { %v2060_v25 = vld [vmem:[#allocation2] ss:$0 sps:$4 sm:$0xff]   ;;  %v915_v26 = vsel %vm910_vm3, %v902_v24, 0  ;;  %v975_v38 = vsel %vm973_vm4, %v903_v37, 0  ;;  %v2063_v16 = vld [vmem:[#allocation3] ss:$0 sps:$4 sm:$0xff]  }
 0x1e4   : > { %v2061_v27 = vld [vmem:[#allocation2] ss:$0 sps:$4 sm:$0xff]   ;;  %1875 = vmatpush3.bf16.xpose.msra.mxu1 %v915_v26  ;;  %1157 = vrot.lane.b32.xlu1 %v2060_v25, %s2433_s11  ;;  %v2064_v32 = vld [vmem:[#allocation3] ss:$0 sps:$4 sm:$0xff]  }
 0x1e5   : > { %1028 = vrot.lane.b32.xlu0 %v2061_v27, %s2434_s17  ;;  %1886 = vmatprep.subr.bf16.mxu1 %v2431_v0  ;;  %v2062_v29 = vld [vmem:[#allocation2] ss:$0 sps:$4 sm:$0xff]   ;;  %v2065_v36 = vld [vmem:[#allocation3] ss:$0 sps:$4 sm:$0xff]  }
 0x1e6   : > { %1881 = vmatpush3.bf16.msra.mxu0 %v975_v38 }
 0x1e7   : > { %1892 = vmatprep.subr.bf16.mxu0 %v2431_v0 }
 0x1e8   : > { %1152 = vrot.lane.b32.xlu1 %v901_v28, %s2433_s11 }
 0x1e9   : > { %1023 = vrot.lane.b32.xlu0 %v901_v28, %s2434_s17 }
 0x1eb   : > { %1877 = vmatmul.mubr.msk.bf16.vlgmr.msra.gmra.mrb[4].mxu1 %vm910_vm3, %v901_v28 }
 0x1ec   : > { %1281 = vrot.lane.b32.xlu1 %v901_v28, %s2435_s18  ;;  %1888 = vmatprep.mubr.msk.bf16.mxu1 %vm2432_vm0, %v2431_v0 }
 0x1ed   : > { %1286 = vrot.lane.b32.xlu0 %v2062_v29, %s2435_s18 }
 0x256   : > { %v1158_v41 = vpop.permute.xlu1 %1157 }
 0x257   : > { %v1029_v39 = vpop.permute.xlu0 %1028  ;;  %v1163_v43 = vsel %vm910_vm3, %v1158_v41, 0 }
 0x258   : > { %v1034_v40 = vsel %vm910_vm3, %v1029_v39, 0 }
 0x259   : > { %1887 = vmatpush3.bf16.xpose.msra.mxu1 %v1034_v40 }
 0x25a   : > { %1898 = vmatprep.subr.bf16.mxu1 %v2431_v0  ;;  %v1153_v45 = vpop.permute.xlu1 %1152 }
 0x25b   : > { %v1024_v42 = vpop.permute.xlu0 %1023 }
 0x25e   : > { %v1282_v47 = vpop.permute.xlu1 %1281 }
 0x25f   : > { %v1287_v44 = vpop.permute.xlu0 %1286 }
 0x260   : > { %1889 = vmatmul.mubr.msk.bf16.vlgmr.msra.gmra.mrb[8].mxu1 %vm910_vm3, %v1024_v42  ;;  %v1292_v46 = vsel %vm910_vm3, %v1287_v44, 0 }
 0x261   : > { %1899 = vmatpush3.bf16.xpose.msra.mxu1 %v1163_v43  ;;  %1900 = vmatprep.mubr.msk.bf16.mxu1 %vm2432_vm0, %v2431_v0 }
 0x262   : > { %1910 = vmatprep.subr.bf16.mxu1 %v2431_v0 }
 0x268   : > { %1901 = vmatmul.mubr.msk.bf16.vlgmr.msra.gmra.mrb[12].mxu1 %vm910_vm3, %v1153_v45 }
 0x269   : > { %1911 = vmatpush3.bf16.xpose.msra.mxu1 %v1292_v46  ;;  %1912 = vmatprep.mubr.msk.bf16.mxu1 %vm2432_vm0, %v2431_v0 }
 0x26a   : > { %1922 = vmatprep.subr.bf16.mxu1 %v2431_v0 }
 0x270   : > { %1913 = vmatmul.mubr.msk.bf16.vlgmr.msra.gmra.mrb[16].mxu1 %vm910_vm3, %v1282_v47 }
 0x271   : > { %1926 = vmatprep.mubr.msk.bf16.mxu1 %vm2432_vm0, %v2431_v0 }
 0x2be   : > { %v951_v49 = vpop.f32.mrb[4].mxu1 }
 0x2bf   : > { %v952_v50 = vadd.f32 %v1784_v48, %v951_v49  ;;  %v1878_v51 = vpop.f32.mrb[5].mxu1 }
 0x2c0   : > { %v954_v52 = vpop.f32.mrb[6].mxu1 }
 0x2c1   : > { %v1879_v53 = vpop.f32.mrb[7].mxu1  ;;  %v957_v54 = vsel %vm910_vm3, %v952_v50, -inf }
 0x2c2   : > { %958 = vmax.xlane.f32.xlu0 %v957_v54 }
 0x333   : > { %v1070_v55 = vpop.f32.mrb[8].mxu1 }
 0x334   : > { %v1071_v56 = vadd.f32 %v1784_v48, %v1070_v55  ;;  %v1890_v57 = vpop.f32.mrb[9].mxu1 }
 0x335   : > { %v1073_v58 = vpop.f32.mrb[10].mxu1 }
 0x336   : > { %v1891_v59 = vpop.f32.mrb[11].mxu1  ;;  %v1076_v60 = vsel %vm910_vm3, %v1071_v56, -inf }
 0x337   : > { %1077 = vmax.xlane.f32.xlu1 %v1076_v60 }
 0x33b   : > { %v1199_v61 = vpop.f32.mrb[12].mxu1 }
 0x33c   : > { %v1200_v62 = vadd.f32 %v1784_v48, %v1199_v61  ;;  %v1902_v63 = vpop.f32.mrb[13].mxu1 }
 0x33d   : > { %v1202_v1 = vpop.f32.mrb[14].mxu1 }
 0x33e   : > { %v1903_v2 = vpop.f32.mrb[15].mxu1  ;;  %v1205_v3 = vsel %vm910_vm3, %v1200_v62, -inf }
 0x33f   : > { %1206 = vmax.xlane.f32.xlu0 %v1205_v3  ;;  %v2066_v3 = vld [vmem:[%s3145_s29] sm:$0xff]  }
 0x340   : > { %1923 = vmatpush3.bf16.msra.mxu1 %v2066_v3 }
 0x341   : > { %1924 = vmatprep.subr.bf16.mxu1 %v2431_v0 }
 0x343   : > { %v1328_v4 = vpop.f32.mrb[16].mxu1 }
 0x344   : > { %v1329_v5 = vadd.f32 %v1784_v48, %v1328_v4  ;;  %v1914_v7 = vpop.f32.mrb[17].mxu1 }
 0x345   : > { %v1331_v8 = vpop.f32.mrb[18].mxu1 }
 0x346   : > { %v1915_v9 = vpop.f32.mrb[19].mxu1  ;;  %v1334_v10 = vsel %vm910_vm3, %v1329_v5, -inf }
 0x347   : > { %1335 = vmax.xlane.f32.xlu0 %v1334_v10 }
 0x34f   : > { %v959_v11 = vpop.xlane.xlu0 %958 }
 0x350   : > { %v960_v12 = vsub.f32 %v952_v50, %v959_v11 }
 0x352   : > { %v961_v13 = vmul.f32 1.442695, %v960_v12 }
 0x354   : > { %2068 = vpow2.f32 %v961_v13 }
 0x35e   : > { %v2069_v14 = vpop.eup %2068 }
 0x35f   : > { %v963_v15 = vsel %vm910_vm3, %v2069_v14, 0.0 }
 0x360   : > { %964 = vadd.xlane.f32.xlu1 %v963_v15 }
 0x371   : > { %1093 = vrot.lane.b32.xlu1 %v2063_v16, %s2434_s17 }
 0x3c4   : > { %v1078_v17 = vpop.xlane.xlu1 %1077 }
 0x3c5   : > { %v1079_v18 = vsub.f32 %v1071_v56, %v1078_v17 }
 0x3c7   : > { %v1080_v19 = vmul.f32 1.442695, %v1079_v18 }
 0x3c9   : > { %2070 = vpow2.f32 %v1080_v19  ;;  %v1805_v19 = vld [vmem:[%s3146_s25] ss:$0 sm:$0xff] }
 0x3cc   : > { %v1207_v20 = vpop.xlane.xlu0 %1206 }
 0x3cd   : > { %v1208_v21 = vsub.f32 %v1200_v62, %v1207_v20 }
 0x3cf   : > { %v1209_v22 = vmul.f32 1.442695, %v1208_v21 }
 0x3d1   : > { %2072 = vpow2.f32 %v1209_v22 }
 0x3d3   : > { %v2071_v23 = vpop.eup %2070 }
 0x3d4   : > { %v1336_v24 = vpop.xlane.xlu0 %1335  ;;  %v1082_v25 = vsel %vm910_vm3, %v2071_v23, 0.0 }
 0x3d5   : > { %v1337_v26 = vsub.f32 %v1329_v5, %v1336_v24  ;;  %1083 = vadd.xlane.f32.xlu0 %v1082_v25  ;;  %v2067_v5 = vld [vmem:[%s3145_s29 + $0x8] sm:$0xff]  }
 0x3d6   : > { %1925 = vmatpush3.bf16.msra.mxu1 %v2067_v5 }
 0x3d7   : > { %v1338_v27 = vmul.f32 1.442695, %v1337_v26 }
 0x3d9   : > { %2074 = vpow2.f32 %v1338_v27 }
 0x3db   : > { %v2073_v28 = vpop.eup %2072 }
 0x3dc   : > { %v1211_v29 = vsel %vm910_vm3, %v2073_v28, 0.0 }
 0x3dd   : > { %1212 = vadd.xlane.f32.xlu1 %v1211_v29 }
 0x3e3   : > { %v2075_v30 = vpop.eup %2074 }
 0x3e4   : > { %v1340_v31 = vsel %vm910_vm3, %v2075_v30, 0.0 }
 0x3e5   : > { %1341 = vadd.xlane.f32.xlu0 %v1340_v31 }
 0x3ed   : > { %v965_v33 = vpop.xlane.xlu1 %964 }
 0x3ee   : > { %2076 = vrcp.f32 %v965_v33  ;;  %1351 = vrot.lane.b32.xlu1 %v2064_v32, %s2435_s18  ;;  %s3148_s18 = sld [smem:[#allocation42_spill]] }
 0x3f1   : > { %v1094_v37 = vpop.permute.xlu1 %1093 }
 0x3f2   : > { %v1099_v39 = vsel %vm973_vm4, %v1094_v37, 0 }
 0x3f4   : > { %s3149_s14 = smov %s3148_s18  ;;  %s2979_s12 = scalar_lea.hbm %s3148_s18, %s1821_s4 }
 0x3f8   : > { %v2077_v34 = vpop.eup %2076 }
 0x3f9   : > { %v967_v35 = vmul.f32 %v2077_v34, %v2069_v14 }
 0x3fb   : > { %968 = vst.msk [vmem:[%s2933_s30] sm:$0xff] %vm910_vm3, %v967_v35  ;;  %1222 = vrot.lane.b32.xlu0 %v2065_v36, %s2433_s11  ;;  %v969_v38 = vpack.c.bf16 %v967_v35, %v967_v35 }
 0x3fd   : > { %1883 = vmatmul.mubr.msk.bf16.vlgmr.msra.gmra.mrb[8].mxu0 %vm910_vm3, %v969_v38 }
 0x3fe   : > { %1893 = vmatpush3.bf16.msra.mxu0 %v1099_v39  ;;  %1894 = vmatprep.mubr.msk.bf16.mxu0 %vm2432_vm0, %v2431_v0 }
 0x3ff   : > { %1904 = vmatprep.subr.bf16.mxu0 %v2431_v0 }
 0x462   : > { %v1084_v40 = vpop.xlane.xlu0 %1083 }
 0x463   : > { %2078 = vrcp.f32 %v1084_v40 }
 0x46a   : > { %v1213_v41 = vpop.xlane.xlu1 %1212 }
 0x46b   : > { %2080 = vrcp.f32 %v1213_v41 }
 0x46d   : > { %v2079_v42 = vpop.eup %2078 }
 0x46e   : > { %v1086_v43 = vmul.f32 %v2079_v42, %v2071_v23  ;;  %v1352_v50 = vpop.permute.xlu1 %1351 }
 0x46f   : > { %v1357_v52 = vsel %vm973_vm4, %v1352_v50, 0 }
 0x470   : > { %1789 = vst.msk [vmem:[%s2933_s30 + $0x8] sm:$0xff] %vm910_vm3, %v1086_v43  ;;  %v1089_v44 = vpack.c.bf16 %v1086_v43, %v1086_v43 }
 0x472   : > { %1895 = vmatmul.mubr.msk.bf16.vlgmr.msra.gmra.mrb[12].mxu0 %vm910_vm3, %v1089_v44  ;;  %v1342_v45 = vpop.xlane.xlu0 %1341 }
 0x473   : > { %2082 = vrcp.f32 %v1342_v45  ;;  %1906 = vmatprep.mubr.msk.bf16.mxu0 %vm2432_vm0, %v2431_v0 }
 0x475   : > { %v2081_v46 = vpop.eup %2080 }
 0x476   : > { %v1215_v47 = vmul.f32 %v2081_v46, %v2073_v28  ;;  %v1223_v48 = vpop.permute.xlu0 %1222 }
 0x477   : > { %v1228_v49 = vsel %vm973_vm4, %v1223_v48, 0 }
 0x478   : > { %1795 = vst.msk [vmem:[%s2933_s30 + $0x10] sm:$0xff] %vm910_vm3, %v1215_v47  ;;  %1905 = vmatpush3.bf16.msra.mxu0 %v1228_v49  ;;  %v1218_v51 = vpack.c.bf16 %v1215_v47, %v1215_v47 }
 0x479   : > { %1916 = vmatprep.subr.bf16.mxu0 %v2431_v0 }
 0x47b   : > { %1907 = vmatmul.mubr.msk.bf16.vlgmr.msra.gmra.mrb[16].mxu0 %vm910_vm3, %v1218_v51 }
 0x47c   : > { %1917 = vmatpush3.bf16.msra.mxu0 %v1357_v52  ;;  %1918 = vmatprep.mubr.msk.bf16.mxu0 %vm2432_vm0, %v2431_v0 }
 0x47d   : > { %v2083_v53 = vpop.eup %2082 }
 0x47e   : > { %v1344_v54 = vmul.f32 %v2083_v53, %v2075_v30 }
 0x480   : > { %1801 = vst.msk [vmem:[%s2933_s30 + $0x18] sm:$0xff] %vm910_vm3, %v1344_v54  ;;  %v1347_v55 = vpack.c.bf16 %v1344_v54, %v1344_v54 }
 0x483   : > { %1919 = vmatmul.mubr.msk.bf16.vlgmr.msra.gmra.mrb[20].mxu0 %vm910_vm3, %v1347_v55 }
 0x4d0   : > { %v1011_v56 = vpop.f32.mrb[8].mxu0 }
 0x4d1   : > { %v1017_v57 = vpack.c.bf16 %v1011_v56, %v1011_v56  ;;  %v1884_v58 = vpop.f32.mrb[9].mxu0 }
 0x4d2   : > { %v1014_v59 = vpop.f32.mrb[10].mxu0 }
 0x4d3   : > { %1019 = vst.msk [vmem:[#allocation4] sm:$0xf] %vm1018_vm5, %v1017_v57  ;;  %v1885_v60 = vpop.f32.mrb[11].mxu0 }
 0x545   : > { %v1135_v61 = vpop.f32.mrb[12].mxu0 }
 0x546   : > { %v1818_v62 = vpack.c.bf16 %v1135_v61, %v1135_v61  ;;  %v1896_v63 = vpop.f32.mrb[13].mxu0 }
 0x547   : > { %v1138_v1 = vpop.f32.mrb[14].mxu0 }
 0x548   : > { %1145 = vrot.lane.b32.xlu1 %v1818_v62, %s2436_s20  ;;  %v1897_v2 = vpop.f32.mrb[15].mxu0 }
 0x54e   : > { %v1264_v4 = vpop.f32.mrb[16].mxu0 }
 0x54f   : > { %v1819_v7 = vpack.c.bf16 %v1264_v4, %v1264_v4  ;;  %v1908_v8 = vpop.f32.mrb[17].mxu0 }
 0x550   : > { %v1267_v9 = vpop.f32.mrb[18].mxu0 }
 0x551   : > { %1274 = vrot.lane.b32.xlu0 %v1819_v7, %s2437_s27  ;;  %v1909_v10 = vpop.f32.mrb[19].mxu0  ;;  %s2294_s27 = sshll.u32 %s2439_s26, 4  ;;  %s2295_s27 = int_to_ptr.vmem [resolvable:$false] %s2294_s27 }
 0x552   : > { %s2296_s30 = scalar_lea.vmem %s2295_s27, 1024  ;;  %p2297_p11 = scmp.lt.s32.totalorder %s2981_s1, %s2295_s27 }
 0x553   : > { %p2298_p9 = scmp.lt.s32.totalorder %s2296_s30, %s2290_s8 }
 0x555   : > { %p2299_p5 = por %p2298_p9, %p2297_p11 }
 0x556   : > { %v1393_v11 = vpop.f32.mrb[20].mxu0 }
 0x557   : > { %v1820_v12 = vpack.c.bf16 %v1393_v11, %v1393_v11  ;;  %v1920_v13 = vpop.f32.mrb[21].mxu0  ;;  %p2300_p7 = pnand %p2299_p5, %p2293_p0 }
 0x558   : > { %v1396_v14 = vpop.f32.mrb[22].mxu0 }
 0x559   : > { %1403 = vrot.lane.b32.xlu1 %v1820_v12, %s2438_s24  ;;  %v1921_v15 = vpop.f32.mrb[23].mxu0 }
 0x5ba   : > { %v1146_v16 = vpop.permute.xlu1 %1145 }
 0x5bb   : > { %1149 = vst.msk [vmem:[#allocation4] sm:$0xf] %vm1148_vm6, %v1146_v16 }
 0x5c3   : > { %v1275_v17 = vpop.permute.xlu0 %1274 }
 0x5c4   : > { %1278 = vst.msk [vmem:[#allocation4] sm:$0xf] %vm1277_vm7, %v1275_v17 }
 0x5cb   : > { %v1404_v0 = vpop.permute.xlu1 %1403 }
 0x5cc   : > { %1407 = vst.msk [vmem:[#allocation4] sm:$0xf] %vm1406_vm8, %v1404_v0 }
 0x5d3   : > { %v1408_v18 = vld [vmem:[#allocation4] sm:$0xf] }
 0x5d4   : > { %1927 = vmatmul.mubr.msk.bf16.vlgmr.msra.gmra.mrb[20].mxu1 %vm717_vm1, %v1408_v18 }
 0x6a7   : > { %v1469_v20 = vpop.f32.mrb[20].mxu1 }
 0x6a8   : > { %v1470_v21 = vadd.f32 %v1805_v19, %v1469_v20  ;;  %v1928_v22 = vpop.f32.mrb[21].mxu1 }
 0x6a9   : > { %v1472_v23 = vpop.f32.mrb[22].mxu1 }
 0x6aa   : > { %v1929_v24 = vpop.f32.mrb[23].mxu1  ;;  %v1475_v25 = vadd.f32 %v1470_v21, %v2869_v6 }
 0x6ac   : > { %v1476_v26 = vsel %vm717_vm1, %v1475_v25, 0.0 }
 0x6ad   : > { %1477 = vadd.xlane.f32.xlu0 %v1476_v26 }
 0x73a   : > { %v1478_v27 = vpop.xlane.xlu0 %1477 }
 0x73b   : > { %v1480_v28 = vmul.f32 0.03125, %v1478_v27 }
 0x73d   : > { %v1481_v29 = vsub.f32 %v1475_v25, %v1480_v28 }
 0x73f   : > { %v1482_v30 = vmul.f32 %v1481_v29, %v1481_v29 }
 0x741   : > { %v1483_v31 = vsel %vm717_vm1, %v1482_v30, 0.0 }
 0x742   : > { %1484 = vadd.xlane.f32.xlu1 %v1483_v31 }
 0x743   : > { %2303 = shalt.err (!%p2300_p7)
}
 0x744   : > { %s2304_s24 = scalar_lea.hbm %s2979_s12, 512  ;;  %s2308_s25 = scalar_lea.hbm %s3149_s14, 1024 }
 0x745   : > { %p2305_p10 = scmp.ne.s32.totalorder %s2979_s12, %s2304_s24  ;;  %p2309_p4 = scmp.lt.u32.totalorder %s2979_s12, %s3149_s14 }
 0x746   : > { %p2310_p2 = scmp.lt.u32.totalorder %s2308_s25, %s2304_s24  ;;  %p2312_p13 = scmp.lt.u32.totalorder %s2304_s24, %s2979_s12 }
 0x747   : > { %p2306_p6 = pnand %p2305_p10, %p3150_p12 }
 0x748   : > { %p2311_p8 = por %p2310_p2, %p2309_p4 }
 0x749   : > { %p2307_p1 = pneg %p2306_p6 }
 0x74a   : > { %p2313_p3 = por %p2312_p13, %p2311_p8 }
 0x74c   : > { %p2314_p0 = pnand %p2313_p3, %p2307_p1 }
 0x74e   : > { %2317 = shalt.err (!%p2314_p0)
}
 0x74f   : > { %s2440_s17 = smov 128   ;;  %s3151_s26 = sld [smem:[#allocation39_spill]] }
 0x750   : > { %1951 = dma.vmem_to_hbm [thread:$0]  (%p3150_p12), %s2981_s1, 512, %s2979_s12, %s1513_s13, %s2440_s17, %s2440_s17, %s2436_s20  }
 0x751   : > { %s3152_s24 = sld [smem:[#allocation40_spill]]  ;;  %s1813_s5 = sshll.u32 %s3147_s16, 7 }
 0x752   : > { %s678_s10 = scalar_lea.vmem [#allocation17], %s1764_s28  ;;  %s3153_s13 = sld [smem:[#allocation41_spill]] }
 0x753   : > { %s1527_s20 = sshll.u32 %s678_s10, 4  ;;  %s1508_s4 = scalar_lea.sflag [#allocation7], %s2818_s21  ;;  %s3022_s20 = int_to_ptr.vmem [resolvable:$true] %s1527_s20 }
 0x754   : > { %s2318_s11 = scalar_lea.vmem %s3022_s20, 128  ;;  %s2441_s28 = smov [#allocation17]  }
 0x755   : > { %v1809_v35 = vld [vmem:[%s3151_s26] ss:$0 sm:$0xff]  ;;  %p2319_p11 = scmp.ne.s32.totalorder %s3022_s20, %s2318_s11  ;;  %s2322_s16 = sshll.u32 %s2441_s28, 4  ;;  %s2323_s16 = int_to_ptr.vmem [resolvable:$false] %s2322_s16 }
 0x756   : > { %s2324_s17 = scalar_lea.vmem %s2323_s16, 256  ;;  %p2325_p7 = scmp.lt.s32.totalorder %s3022_s20, %s2323_s16 }
 0x757   : > { %v1810_v37 = vld [vmem:[%s3152_s24] ss:$0 sm:$0xff]  ;;  %p2320_p9 = pnand %p2319_p11, %p3150_p12  ;;  %p2326_p10 = scmp.lt.s32.totalorder %s2324_s17, %s2318_s11 }
 0x758   : > { %s3020_s25 = scalar_lea.hbm %s3153_s13, %s1813_s5 }
 0x759   : > { %p2321_p5 = pneg %p2320_p9  ;;  %p2327_p6 = por %p2326_p10, %p2325_p7 }
 0x75b   : > { %p2328_p1 = pnand %p2327_p6, %p2321_p5 }
 0x7cf   : > { %v1485_v6 = vpop.xlane.xlu1 %1484 }
 0x7d0   : > { %v1486_v32 = vmul.f32 0.03125, %v1485_v6 }
 0x7d2   : > { %v1487_v33 = vadd.f32 1e-05, %v1486_v32 }
 0x7d4   : > { %2084 = vrsqrt.f32 %v1487_v33 }
 0x7de   : > { %v2085_v34 = vpop.eup %2084 }
 0x7df   : > { %v1489_v36 = vmul.f32 %v2085_v34, %v1481_v29 }
 0x7e1   : > { %v1497_v38 = vmul.f32 %v1809_v35, %v1489_v36 }
 0x7e3   : > { %v1505_v39 = vadd.f32 %v1810_v37, %v1497_v38 }
 0x7e5   : > { %1506 = vst.msk [vmem:[%s678_s10] sm:$0xff] %vm717_vm1, %v1505_v39 }
 0x7e6   : > { %2331 = shalt.err (!%p2328_p1)
}
 0x7e7   : > { %s2332_s21 = scalar_lea.hbm %s3020_s25, 128  ;;  %s2336_s26 = scalar_lea.hbm %s3153_s13, 256 }
 0x7e8   : > { %p2333_p4 = scmp.ne.s32.totalorder %s3020_s25, %s2332_s21  ;;  %p2337_p13 = scmp.lt.u32.totalorder %s3020_s25, %s3153_s13 }
 0x7e9   : > { %p2338_p3 = scmp.lt.u32.totalorder %s2336_s26, %s2332_s21  ;;  %p2340_p11 = scmp.lt.u32.totalorder %s2332_s21, %s3020_s25 }
 0x7ea   : > { %p2334_p2 = pnand %p2333_p4, %p3150_p12 }
 0x7eb   : > { %p2339_p0 = por %p2338_p3, %p2337_p13 }
 0x7ec   : > { %p2335_p8 = pneg %p2334_p2 }
 0x7ed   : > { %p2341_p9 = por %p2340_p11, %p2339_p0 }
 0x7ef   : > { %p2342_p5 = pnand %p2341_p9, %p2335_p8 }
 0x7f1   : > { %2345 = shalt.err (!%p2342_p5)
}
 0x7f2   : > { %1950 = dma.vmem_to_hbm [thread:$0]  (%p3150_p12), %s3022_s20, 128, %s3020_s25, %s1508_s4  }
 0x7f3 PF: > { %s3154_s24 = sld [smem:[#allocation27_spill]]  ;;  %s3155_s5 = sld [smem:[#allocation30_spill]] }
 0x7f4   : > { %p3157_p10 = scmp.ge.s32.totalorder %s2420_s23, 2 }
 0x7f9   : > { %s1556_s10 = sand.u32 1, %s3154_s24   ;;  %p3156_p7 = scmp.ne.s32.totalorder %s3155_s5, 0 }
 0x7fa   : > { %s1557_s1 = scalar_lea.sflag [#allocation7], %s1556_s10 }
 0x7fb   : > { %p1978_p6 = pnand %p3157_p10, %p3156_p7 }
 0x7fd   : > { %2391 = dma.done.wait (!%p1978_p6), %s1557_s1, 128  }
 0x7fe   : > { %2393 = vsyncadd (!%p1978_p6), %s1557_s1, 4294967168  ;;  %s1566_s12 = scalar_lea.sflag [#allocation19], %s1556_s10 }
 0x7ff   : > { %2395 = dma.done.wait (!%p1978_p6), %s1566_s12, 512  }
 0x800   : > { %2397 = vsyncadd (!%p1978_p6), %s1566_s12, 4294966784  ;;  %s42_s23 = sadd.s32 1, %s2420_s23   ;;  %s3158_s15 = sld [smem:[#allocation28_spill]] }
 0x801   : > { %p39_p1 = scmp.ge.s32.totalorder %s42_s23, 4   ;;  %s3159_s20 = sld [smem:[#allocation32_spill]] }
 0x802   : > { %s3160_s25 = sld [smem:[#allocation31_spill]]  ;;  %s3161_s18 = smov %s2404_s19 }
 0x803   : > { %s3163_s21 = smov %s2416_s22  ;;  %41 = sbr.rel (!%p39_p1) target bundleno = 24 (0x18), region = 194 }
 0x806   : > { %s3162_s19 = smov %s3158_s15 }
 0x808   : > { %s3164_s22 = smov %s3160_s25 }
 0x80a   :  { %1571 = vsyncpa [#allocation6], 1 }
 0x80b   :  { %1573 = vsyncpa [#allocation6 + $0x1], 1 }
 0x80c   :  { %1574 = vsyncpa [#allocation9], 1 }
 0x80d   :  { %1576 = vsyncpa [#allocation9 + $0x1], 1 }
 0x80e   :  { %1577 = vsyncpa [#allocation12], 1 }
 0x80f   :  { %1579 = vsyncpa [#allocation12 + $0x1], 1 }
 0x810   :  { %1580 = vsyncpa [#allocation15], 1 }
 0x811   :  { %1581 = vsyncpa [#allocation7], 1 }
 0x812   :  { %1583 = vsyncpa [#allocation7 + $0x1], 1 }
 0x813   :  { %1584 = vsyncpa [#allocation19], 1 }
 0x814   :  { %1586 = vsyncpa [#allocation19 + $0x1], 1 }

</bundles_post_ra>
